<compile_context>
chip_gen: v6e
topology: v6e:2x2x1
jax: 0.10.0
libtpu: 0.0.40
codegen_flags: <defaults>
</compile_context>

<pallas_src>
import functools

import jax
import jax.numpy as jnp
from jax.experimental import pallas as pl
from jax.experimental.pallas import tpu as pltpu


# ----------------------------------------------------------------------------
# Architecture constants (assumed SimpleCNN: 4->8->16 channels, 16x16 input,
# two 2x2 maxpools, 32-dim embedding).
# ----------------------------------------------------------------------------
C_IN, C1, C2, EMB = 4, 8, 16, 32
H = W = 16
H2, W2 = H // 2, W // 2          # after pool1: 8 x 8
H3, W3 = H2 // 2, W2 // 2        # after pool2: 4 x 4

L_IN = W * C_IN                  # 64 lanes, stage-1 rows
L1 = W2 * C1                     # 64 lanes, pool1/conv2 rows
L2 = W3 * C2                     # 64 lanes, pool2/fc rows


# ----------------------------------------------------------------------------
# Fused embedding kernel (one grid step = `nb` images, all stages in VMEM).
#
# Row layouts (one zero "lead" row + 2 zero separator rows per image so the
# 3x3 convs see their vertical zero padding and the stride-2 vertical pools
# stay globally phase-aligned):
#   stage 1 input : row 1 + 18n + h   holds image n, row h     (18-row stride)
#   stage 2 input : row 1 + 10n + h2  holds pool1(n, h2)       (10-row stride)
# Conv outputs at separator-centered rows are garbage and never read.
# ----------------------------------------------------------------------------
def _embed_kernel(x_ref, m1e_ref, m1o_ref, b1_ref, m2e_ref, m2o_ref, b2_ref,
                  wfc_ref, bfc_ref, o_ref, c1s, h1s, s2, c2s, p2s, *, nb):
    f32 = jnp.float32
    n1 = 18 * nb - 1             # conv1 output rows (incl. separator rows)
    n2 = 10 * nb - 1             # conv2 output rows
    nh1 = 9 * nb - 1             # pool1 vertical-max rows
    nh2 = 5 * nb - 1             # pool2 vertical-max rows

    # ---- conv1: block-Toeplitz matmuls, 3 dy taps x (even | odd columns) ---
    lhs = x_ref[pl.ds(0, n1), :]
    acc_e = jnp.dot(lhs, m1e_ref[0], preferred_element_type=f32)
    acc_o = jnp.dot(lhs, m1o_ref[0], preferred_element_type=f32)
    for dy in (1, 2):
        lhs = x_ref[pl.ds(dy, n1), :]
        acc_e = acc_e + jnp.dot(lhs, m1e_ref[dy], preferred_element_type=f32)
        acc_o = acc_o + jnp.dot(lhs, m1o_ref[dy], preferred_element_type=f32)
    # 2-wide horizontal max-pool == element-wise max of even/odd conv columns
    c1s[...] = jnp.maximum(acc_e, acc_o)

    # ---- pool1 vertical (whole-buffer stride-2 rows) + bias + ReLU ---------
    t1 = jnp.maximum(c1s[pl.ds(0, nh1, stride=2), :],
                     c1s[pl.ds(1, nh1, stride=2), :])
    h1s[...] = jnp.maximum(t1 + b1_ref[...], 0.0)       # rows 9n+8 are junk

    # ---- re-pack pool1 rows into the zero-separated stage-2 layout ---------
    s2[...] = jnp.zeros_like(s2)                        # pads/separators = 0
    for n in range(nb):
        s2[1 + 10 * n:9 + 10 * n, :] = h1s[pl.ds(9 * n, 8), :]

    # ---- conv2: same Toeplitz scheme (K=64, N=64) --------------------------
    lhs = s2[pl.ds(0, n2), :]
    acc_e = jnp.dot(lhs, m2e_ref[0], preferred_element_type=f32)
    acc_o = jnp.dot(lhs, m2o_ref[0], preferred_element_type=f32)
    for dy in (1, 2):
        lhs = s2[pl.ds(dy, n2), :]
        acc_e = acc_e + jnp.dot(lhs, m2e_ref[dy], preferred_element_type=f32)
        acc_o = acc_o + jnp.dot(lhs, m2o_ref[dy], preferred_element_type=f32)
    c2s[...] = jnp.maximum(acc_e, acc_o)

    # ---- pool2 vertical + bias + ReLU --------------------------------------
    t2 = jnp.maximum(c2s[pl.ds(0, nh2, stride=2), :],
                     c2s[pl.ds(1, nh2, stride=2), :])
    p2s[...] = jnp.maximum(t2 + b2_ref[...], 0.0)       # rows 5n+4 are junk

    # ---- fc: 4 pooled rows per image, 4 K=64 matmuls ------------------------
    acc = jnp.dot(p2s[pl.ds(0, nb, stride=5), :], wfc_ref[0],
                  preferred_element_type=f32)
    for h3 in (1, 2, 3):
        acc = acc + jnp.dot(p2s[pl.ds(h3, nb, stride=5), :], wfc_ref[h3],
                            preferred_element_type=f32)
    o_ref[...] = (acc + bfc_ref[...]).astype(o_ref.dtype)


# ----------------------------------------------------------------------------
# Wrapper: one fused pallas_call over the whole (concatenated) batch
# ----------------------------------------------------------------------------
def _embed_images(x_nchw, p):
    tot = x_nchw.shape[0]
    # 2-TC split only on multi-TC parts with enough work per core (review:
    # v5e/v6e have one TensorCore -> grid=(1,) is strictly better there, and
    # tiny batches don't amortize a second core's fixed cost on v7x either).
    grid_g = 2 if (tot % 2 == 0 and tot >= 16) else 1
    nb = tot // grid_g
    r1 = 18 * nb + 1

    # Boundary layout plumbing (once per call): NCHW -> lane-dense NHWC rows
    # (W*C_IN = 64 lanes), 2 zero separator rows per image + 1 leading row.
    x = jnp.transpose(x_nchw, (0, 2, 3, 1)).astype(jnp.float32)
    x = x.reshape(grid_g, nb, H, L_IN)
    x = jnp.pad(x, ((0, 0), (0, 0), (0, 2), (0, 0)))
    x = x.reshape(grid_g, nb * (H + 2), L_IN)
    x = jnp.pad(x, ((0, 0), (1, 0), (0, 0)))            # (grid_g, r1, 64)

    macs = tot * (H * W * 9 * C_IN * C1 + H2 * W2 * 9 * C1 * C2
                  + H3 * W3 * C2 * EMB)
    bytes_accessed = 4 * (x.size + sum(int(v.size) for v in p.values())
                          + tot * EMB)

    out = pl.pallas_call(
        functools.partial(_embed_kernel, nb=nb),
        out_shape=jax.ShapeDtypeStruct((grid_g, nb, EMB), jnp.float32),
        grid=(grid_g,),
        in_specs=[
            pl.BlockSpec((None, r1, L_IN), lambda i: (i, 0, 0)),
            pl.BlockSpec((3, L_IN, L1), lambda i: (0, 0, 0)),
            pl.BlockSpec((3, L_IN, L1), lambda i: (0, 0, 0)),
            pl.BlockSpec((1, L1), lambda i: (0, 0)),
            pl.BlockSpec((3, L1, L2), lambda i: (0, 0, 0)),
            pl.BlockSpec((3, L1, L2), lambda i: (0, 0, 0)),
            pl.BlockSpec((1, L2), lambda i: (0, 0)),
            pl.BlockSpec((H3, L2, EMB), lambda i: (0, 0, 0)),
            pl.BlockSpec((1, EMB), lambda i: (0, 0)),
        ],
        out_specs=pl.BlockSpec((None, nb, EMB), lambda i: (i, 0, 0)),
        scratch_shapes=[
            pltpu.VMEM((18 * nb - 1, L1), jnp.float32),   # c1s: conv1 out
            pltpu.VMEM((9 * nb - 1, L1), jnp.float32),    # h1s: pool1 out
            pltpu.VMEM((10 * nb + 1, L1), jnp.float32),   # s2 : stage-2 input
            pltpu.VMEM((10 * nb - 1, L2), jnp.float32),   # c2s: conv2 out
            pltpu.VMEM((5 * nb - 1, L2), jnp.float32),    # p2s: pool2 out
        ],
        compiler_params=pltpu.CompilerParams(
            dimension_semantics=("parallel",) if grid_g > 1 else ("arbitrary",)),
        cost_estimate=pl.CostEstimate(flops=2 * macs, transcendentals=0,
                                      bytes_accessed=int(bytes_accessed)),
    )(x, p["m1e"], p["m1o"], p["b1r"], p["m2e"], p["m2o"], p["b2r"],
      p["wfc"], p["bfc"])
    return out.reshape(tot, EMB)


def siamese_forward(x1, x2, params):
    """SiameseNet.forward: shared weights -> one fused pass over both inputs."""
    b = x1.shape[0]
    emb = _embed_images(jnp.concatenate([x1, x2], axis=0), params)
    return emb[:b], emb[b:]


def fwd_to_emb_layer(x, params):
    """SiameseNet.fwd_to_emb_layer."""
    return _embed_images(x, params)


# ----------------------------------------------------------------------------
# Parameters: PyTorch-layout init + one-time repack (hoisted out of forward)
# ----------------------------------------------------------------------------
def init_params(key):
    k1, k2, k3, k4, k5 = jax.random.split(key, 5)
    fc_in = C2 * H3 * W3
    return {
        "w1": 0.1 * jax.random.normal(k1, (C1, C_IN, 3, 3), jnp.float32),
        "b1": 0.1 * jax.random.normal(k4, (C1,), jnp.float32),
        "w2": 0.1 * jax.random.normal(k2, (C2, C1, 3, 3), jnp.float32),
        "b2": 0.1 * jax.random.normal(k5, (C2,), jnp.float32),
        "wfc": 0.05 * jax.random.normal(k3, (fc_in, EMB), jnp.float32),
        "bfc": jnp.zeros((EMB,), jnp.float32),
    }


def _toeplitz(k, n_in_w, out_ws):
    """(Cout,Cin,3,3) conv kernel -> (3, n_in_w*Cin, len(out_ws)*Cout) matrices
    so that conv output at width out_ws[j] = sum_dy row_dy @ M[dy]."""
    cout, cin = k.shape[0], k.shape[1]
    kt = jnp.transpose(k, (2, 3, 1, 0))                  # (dy, dx, ci, co)
    wi = jnp.arange(n_in_w)[:, None]
    wo = jnp.asarray(out_ws)[None, :]
    dx = wi - wo + 1                                     # (n_in_w, n_out)
    valid = ((dx >= 0) & (dx <= 2)).astype(k.dtype)
    m = kt[:, jnp.clip(dx, 0, 2), :, :]                  # (3, wi, wo, ci, co)
    m = m * valid[None, :, :, None, None]
    m = jnp.transpose(m, (0, 1, 3, 2, 4))                # (3, wi, ci, wo, co)
    return m.reshape(3, n_in_w * cin, len(out_ws) * cout)


def prepare_params(p):
    """One-time repack of PyTorch-layout weights into kernel layouts."""
    m1e = _toeplitz(p["w1"], W, list(range(0, W, 2)))     # (3, 64, 64)
    m1o = _toeplitz(p["w1"], W, list(range(1, W, 2)))
    m2e = _toeplitz(p["w2"], W2, list(range(0, W2, 2)))   # (3, 64, 64)
    m2o = _toeplitz(p["w2"], W2, list(range(1, W2, 2)))
    # fc rows are torch (c, h, w)-flatten order; repack to (h3, w3*C2+co, emb)
    # so each pooled row (lane layout w3*C2+co) hits one contiguous block.
    wfc = jnp.transpose(p["wfc"].reshape(C2, H3, W3, EMB), (1, 2, 0, 3))
    wfc = wfc.reshape(H3, W3 * C2, EMB)
    return {
        "m1e": m1e, "m1o": m1o, "b1r": jnp.tile(p["b1"], W2).reshape(1, L1),
        "m2e": m2e, "m2o": m2o, "b2r": jnp.tile(p["b2"], W3).reshape(1, L2),
        "wfc": wfc, "bfc": p["bfc"].reshape(1, EMB),
    }


# ----------------------------------------------------------------------------
# Plain-JAX reference of the same (assumed) embedding net, for verification
# ----------------------------------------------------------------------------
def _reference_embed(x_nchw, raw):
    dn = ("NCHW", "OIHW", "NCHW")
    y = jax.lax.conv_general_dilated(x_nchw, raw["w1"], (1, 1),
                                     ((1, 1), (1, 1)), dimension_numbers=dn)
    y = jax.nn.relu(y + raw["b1"][None, :, None, None])
    y = jax.lax.reduce_window(y, -jnp.inf, jax.lax.max,
                              (1, 1, 2, 2), (1, 1, 2, 2), "VALID")
    y = jax.lax.conv_general_dilated(y, raw["w2"], (1, 1),
                                     ((1, 1), (1, 1)), dimension_numbers=dn)
    y = jax.nn.relu(y + raw["b2"][None, :, None, None])
    y = jax.lax.reduce_window(y, -jnp.inf, jax.lax.max,
                              (1, 1, 2, 2), (1, 1, 2, 2), "VALID")
    y = y.reshape(x_nchw.shape[0], -1)                   # (c, h, w) flatten
    return y @ raw["wfc"] + raw["bfc"]


if __name__ == "__main__":
    key = jax.random.PRNGKey(0)
    kx1, kx2, kp = jax.random.split(key, 3)

    B = 2
    x1 = jax.random.normal(kx1, (B, C_IN, H, W), jnp.float32)
    x2 = jax.random.normal(kx2, (B, C_IN, H, W), jnp.float32)

    raw = init_params(kp)
    params = prepare_params(raw)          # one-time repack, outside jit

    out1, out2 = jax.jit(siamese_forward)(x1, x2, params)
    jax.block_until_ready((out1, out2))

    assert out1.shape == (B, EMB) and out2.shape == (B, EMB)

    ref1 = _reference_embed(x1, raw)
    ref2 = _reference_embed(x2, raw)
    err = max(float(jnp.max(jnp.abs(out1 - ref1))),
              float(jnp.max(jnp.abs(out2 - ref2))))
    assert err < 1e-3, f"max abs error vs reference: {err}"
    print("KERNEL_OK")
</pallas_src>

<mosaic_0001>
module attributes {stable_mosaic.version = 11 : i64} {
  func.func @_embed_kernel(%arg0: i32, %arg1: memref<1x73x64xf32, #tpu.memory_space<vmem>>, %arg2: memref<3x64x64xf32, #tpu.memory_space<vmem>>, %arg3: memref<3x64x64xf32, #tpu.memory_space<vmem>>, %arg4: memref<1x64xf32, #tpu.memory_space<vmem>>, %arg5: memref<3x64x64xf32, #tpu.memory_space<vmem>>, %arg6: memref<3x64x64xf32, #tpu.memory_space<vmem>>, %arg7: memref<1x64xf32, #tpu.memory_space<vmem>>, %arg8: memref<4x64x32xf32, #tpu.memory_space<vmem>>, %arg9: memref<1x32xf32, #tpu.memory_space<vmem>>, %arg10: memref<1x4x32xf32, #tpu.memory_space<vmem>>, %arg11: memref<71x64xf32, #tpu.memory_space<vmem>>, %arg12: memref<35x64xf32, #tpu.memory_space<vmem>>, %arg13: memref<41x64xf32, #tpu.memory_space<vmem>>, %arg14: memref<39x64xf32, #tpu.memory_space<vmem>>, %arg15: memref<19x64xf32, #tpu.memory_space<vmem>>) attributes {dimension_semantics = [#tpu.dimension_semantics<arbitrary>], iteration_bounds = array<i64: 1>, scalar_prefetch = 0 : i64, scratch_operands = 5 : i64, tpu.core_type = #tpu.core_type<tc>, window_params = [{transform_indices = @transform_0, window_bounds = array<i64: 1, 73, 64>}, {pipeline_mode = #tpu.pipeline_mode<synchronous>, transform_indices = @transform_1, window_bounds = array<i64: 3, 64, 64>}, {pipeline_mode = #tpu.pipeline_mode<synchronous>, transform_indices = @transform_2, window_bounds = array<i64: 3, 64, 64>}, {pipeline_mode = #tpu.pipeline_mode<synchronous>, transform_indices = @transform_3, window_bounds = array<i64: 1, 64>}, {pipeline_mode = #tpu.pipeline_mode<synchronous>, transform_indices = @transform_4, window_bounds = array<i64: 3, 64, 64>}, {pipeline_mode = #tpu.pipeline_mode<synchronous>, transform_indices = @transform_5, window_bounds = array<i64: 3, 64, 64>}, {pipeline_mode = #tpu.pipeline_mode<synchronous>, transform_indices = @transform_6, window_bounds = array<i64: 1, 64>}, {pipeline_mode = #tpu.pipeline_mode<synchronous>, transform_indices = @transform_7, window_bounds = array<i64: 4, 64, 32>}, {pipeline_mode = #tpu.pipeline_mode<synchronous>, transform_indices = @transform_8, window_bounds = array<i64: 1, 32>}, {transform_indices = @transform_9, window_bounds = array<i64: 1, 4, 32>}]} {
    %c0 = arith.constant 0 : index
    %c0_0 = arith.constant 0 : index
    %c0_1 = arith.constant 0 : index
    %0 = vector.load %arg1[%c0, %c0_0, %c0_1] : memref<1x73x64xf32, #tpu.memory_space<vmem>>, vector<1x71x64xf32>
    %1 = vector.shape_cast %0 : vector<1x71x64xf32> to vector<71x64xf32>
    %c0_2 = arith.constant 0 : index
    %c0_3 = arith.constant 0 : index
    %c0_4 = arith.constant 0 : index
    %2 = vector.load %arg2[%c0_2, %c0_3, %c0_4] : memref<3x64x64xf32, #tpu.memory_space<vmem>>, vector<1x64x64xf32>
    %3 = vector.shape_cast %2 : vector<1x64x64xf32> to vector<64x64xf32>
    %cst = arith.constant dense<0.000000e+00> : vector<71x64xf32>
    %4 = tpu.matmul %1, %3, %cst {dimension_numbers = #tpu.dot_dimension_numbers<[1], [0], [0], [1], [0, 0, 1, 1], [], []>} : vector<71x64xf32>, vector<64x64xf32>, vector<71x64xf32> -> vector<71x64xf32>
    %c0_5 = arith.constant 0 : index
    %c0_6 = arith.constant 0 : index
    %c0_7 = arith.constant 0 : index
    %5 = vector.load %arg3[%c0_5, %c0_6, %c0_7] : memref<3x64x64xf32, #tpu.memory_space<vmem>>, vector<1x64x64xf32>
    %6 = vector.shape_cast %5 : vector<1x64x64xf32> to vector<64x64xf32>
    %cst_8 = arith.constant dense<0.000000e+00> : vector<71x64xf32>
    %7 = tpu.matmul %1, %6, %cst_8 {dimension_numbers = #tpu.dot_dimension_numbers<[1], [0], [0], [1], [0, 0, 1, 1], [], []>} : vector<71x64xf32>, vector<64x64xf32>, vector<71x64xf32> -> vector<71x64xf32>
    %c0_9 = arith.constant 0 : index
    %c1 = arith.constant 1 : index
    %c0_10 = arith.constant 0 : index
    %8 = vector.load %arg1[%c0_9, %c1, %c0_10] : memref<1x73x64xf32, #tpu.memory_space<vmem>>, vector<1x71x64xf32>
    %9 = vector.shape_cast %8 : vector<1x71x64xf32> to vector<71x64xf32>
    %c1_11 = arith.constant 1 : index
    %c0_12 = arith.constant 0 : index
    %c0_13 = arith.constant 0 : index
    %10 = vector.load %arg2[%c1_11, %c0_12, %c0_13] : memref<3x64x64xf32, #tpu.memory_space<vmem>>, vector<1x64x64xf32>
    %11 = vector.shape_cast %10 : vector<1x64x64xf32> to vector<64x64xf32>
    %cst_14 = arith.constant dense<0.000000e+00> : vector<71x64xf32>
    %12 = tpu.matmul %9, %11, %cst_14 {dimension_numbers = #tpu.dot_dimension_numbers<[1], [0], [0], [1], [0, 0, 1, 1], [], []>} : vector<71x64xf32>, vector<64x64xf32>, vector<71x64xf32> -> vector<71x64xf32>
    %13 = arith.addf %4, %12 : vector<71x64xf32>
    %c1_15 = arith.constant 1 : index
    %c0_16 = arith.constant 0 : index
    %c0_17 = arith.constant 0 : index
    %14 = vector.load %arg3[%c1_15, %c0_16, %c0_17] : memref<3x64x64xf32, #tpu.memory_space<vmem>>, vector<1x64x64xf32>
    %15 = vector.shape_cast %14 : vector<1x64x64xf32> to vector<64x64xf32>
    %cst_18 = arith.constant dense<0.000000e+00> : vector<71x64xf32>
    %16 = tpu.matmul %9, %15, %cst_18 {dimension_numbers = #tpu.dot_dimension_numbers<[1], [0], [0], [1], [0, 0, 1, 1], [], []>} : vector<71x64xf32>, vector<64x64xf32>, vector<71x64xf32> -> vector<71x64xf32>
    %17 = arith.addf %7, %16 : vector<71x64xf32>
    %c0_19 = arith.constant 0 : index
    %c2 = arith.constant 2 : index
    %c0_20 = arith.constant 0 : index
    %18 = vector.load %arg1[%c0_19, %c2, %c0_20] : memref<1x73x64xf32, #tpu.memory_space<vmem>>, vector<1x71x64xf32>
    %19 = vector.shape_cast %18 : vector<1x71x64xf32> to vector<71x64xf32>
    %c2_21 = arith.constant 2 : index
    %c0_22 = arith.constant 0 : index
    %c0_23 = arith.constant 0 : index
    %20 = vector.load %arg2[%c2_21, %c0_22, %c0_23] : memref<3x64x64xf32, #tpu.memory_space<vmem>>, vector<1x64x64xf32>
    %21 = vector.shape_cast %20 : vector<1x64x64xf32> to vector<64x64xf32>
    %cst_24 = arith.constant dense<0.000000e+00> : vector<71x64xf32>
    %22 = tpu.matmul %19, %21, %cst_24 {dimension_numbers = #tpu.dot_dimension_numbers<[1], [0], [0], [1], [0, 0, 1, 1], [], []>} : vector<71x64xf32>, vector<64x64xf32>, vector<71x64xf32> -> vector<71x64xf32>
    %23 = arith.addf %13, %22 : vector<71x64xf32>
    %c2_25 = arith.constant 2 : index
    %c0_26 = arith.constant 0 : index
    %c0_27 = arith.constant 0 : index
    %24 = vector.load %arg3[%c2_25, %c0_26, %c0_27] : memref<3x64x64xf32, #tpu.memory_space<vmem>>, vector<1x64x64xf32>
    %25 = vector.shape_cast %24 : vector<1x64x64xf32> to vector<64x64xf32>
    %cst_28 = arith.constant dense<0.000000e+00> : vector<71x64xf32>
    %26 = tpu.matmul %19, %25, %cst_28 {dimension_numbers = #tpu.dot_dimension_numbers<[1], [0], [0], [1], [0, 0, 1, 1], [], []>} : vector<71x64xf32>, vector<64x64xf32>, vector<71x64xf32> -> vector<71x64xf32>
    %27 = arith.addf %17, %26 : vector<71x64xf32>
    %28 = arith.maximumf %23, %27 : vector<71x64xf32>
    %c0_29 = arith.constant 0 : index
    %c0_30 = arith.constant 0 : index
    %29 = vector.load %arg11[%c0_29, %c0_30] : memref<71x64xf32, #tpu.memory_space<vmem>>, vector<71x64xf32>
    tpu.vector_store %arg11[%c0_29, %c0_30], %28 {strides = array<i32>} : memref<71x64xf32, #tpu.memory_space<vmem>>, vector<71x64xf32>,
    %c0_31 = arith.constant 0 : index
    %c0_32 = arith.constant 0 : index
    %30 = tpu.strided_load %arg11[%c0_31, %c0_32] {strides = array<i32: 2, 1>} : memref<71x64xf32, #tpu.memory_space<vmem>>, vector<35x64xf32>
    %c1_33 = arith.constant 1 : index
    %c0_34 = arith.constant 0 : index
    %31 = tpu.strided_load %arg11[%c1_33, %c0_34] {strides = array<i32: 2, 1>} : memref<71x64xf32, #tpu.memory_space<vmem>>, vector<35x64xf32>
    %32 = arith.maximumf %30, %31 : vector<35x64xf32>
    %c0_35 = arith.constant 0 : index
    %c0_36 = arith.constant 0 : index
    %33 = vector.load %arg4[%c0_35, %c0_36] : memref<1x64xf32, #tpu.memory_space<vmem>>, vector<1x64xf32>
    %34 = vector.broadcast %33 : vector<1x64xf32> to vector<35x64xf32>
    %35 = arith.addf %32, %34 : vector<35x64xf32>
    %cst_37 = arith.constant 0.000000e+00 : f32
    %36 = vector.broadcast %cst_37 : f32 to vector<35x64xf32>
    %37 = arith.maximumf %35, %36 : vector<35x64xf32>
    %c0_38 = arith.constant 0 : index
    %c0_39 = arith.constant 0 : index
    %38 = vector.load %arg12[%c0_38, %c0_39] : memref<35x64xf32, #tpu.memory_space<vmem>>, vector<35x64xf32>
    tpu.vector_store %arg12[%c0_38, %c0_39], %37 {strides = array<i32>} : memref<35x64xf32, #tpu.memory_space<vmem>>, vector<35x64xf32>,
    %cst_40 = arith.constant 0.000000e+00 : f32
    %39 = vector.broadcast %cst_40 : f32 to vector<41x64xf32>
    %c0_41 = arith.constant 0 : index
    %c0_42 = arith.constant 0 : index
    %40 = vector.load %arg13[%c0_41, %c0_42] : memref<41x64xf32, #tpu.memory_space<vmem>>, vector<41x64xf32>
    tpu.vector_store %arg13[%c0_41, %c0_42], %39 {strides = array<i32>} : memref<41x64xf32, #tpu.memory_space<vmem>>, vector<41x64xf32>,
    %c0_43 = arith.constant 0 : index
    %c0_44 = arith.constant 0 : index
    %41 = vector.load %arg12[%c0_43, %c0_44] : memref<35x64xf32, #tpu.memory_space<vmem>>, vector<8x64xf32>
    %c1_45 = arith.constant 1 : index
    %c0_46 = arith.constant 0 : index
    %42 = vector.load %arg13[%c1_45, %c0_46] : memref<41x64xf32, #tpu.memory_space<vmem>>, vector<8x64xf32>
    tpu.vector_store %arg13[%c1_45, %c0_46], %41 {strides = array<i32>} : memref<41x64xf32, #tpu.memory_space<vmem>>, vector<8x64xf32>,
    %c9 = arith.constant 9 : index
    %c0_47 = arith.constant 0 : index
    %43 = vector.load %arg12[%c9, %c0_47] : memref<35x64xf32, #tpu.memory_space<vmem>>, vector<8x64xf32>
    %c11 = arith.constant 11 : index
    %c0_48 = arith.constant 0 : index
    %44 = vector.load %arg13[%c11, %c0_48] : memref<41x64xf32, #tpu.memory_space<vmem>>, vector<8x64xf32>
    tpu.vector_store %arg13[%c11, %c0_48], %43 {strides = array<i32>} : memref<41x64xf32, #tpu.memory_space<vmem>>, vector<8x64xf32>,
    %c18 = arith.constant 18 : index
    %c0_49 = arith.constant 0 : index
    %45 = vector.load %arg12[%c18, %c0_49] : memref<35x64xf32, #tpu.memory_space<vmem>>, vector<8x64xf32>
    %c21 = arith.constant 21 : index
    %c0_50 = arith.constant 0 : index
    %46 = vector.load %arg13[%c21, %c0_50] : memref<41x64xf32, #tpu.memory_space<vmem>>, vector<8x64xf32>
    tpu.vector_store %arg13[%c21, %c0_50], %45 {strides = array<i32>} : memref<41x64xf32, #tpu.memory_space<vmem>>, vector<8x64xf32>,
    %c27 = arith.constant 27 : index
    %c0_51 = arith.constant 0 : index
    %47 = vector.load %arg12[%c27, %c0_51] : memref<35x64xf32, #tpu.memory_space<vmem>>, vector<8x64xf32>
    %c31 = arith.constant 31 : index
    %c0_52 = arith.constant 0 : index
    %48 = vector.load %arg13[%c31, %c0_52] : memref<41x64xf32, #tpu.memory_space<vmem>>, vector<8x64xf32>
    tpu.vector_store %arg13[%c31, %c0_52], %47 {strides = array<i32>} : memref<41x64xf32, #tpu.memory_space<vmem>>, vector<8x64xf32>,
    %c0_53 = arith.constant 0 : index
    %c0_54 = arith.constant 0 : index
    %49 = vector.load %arg13[%c0_53, %c0_54] : memref<41x64xf32, #tpu.memory_space<vmem>>, vector<39x64xf32>
    %c0_55 = arith.constant 0 : index
    %c0_56 = arith.constant 0 : index
    %c0_57 = arith.constant 0 : index
    %50 = vector.load %arg5[%c0_55, %c0_56, %c0_57] : memref<3x64x64xf32, #tpu.memory_space<vmem>>, vector<1x64x64xf32>
    %51 = vector.shape_cast %50 : vector<1x64x64xf32> to vector<64x64xf32>
    %cst_58 = arith.constant dense<0.000000e+00> : vector<39x64xf32>
    %52 = tpu.matmul %49, %51, %cst_58 {dimension_numbers = #tpu.dot_dimension_numbers<[1], [0], [0], [1], [0, 0, 1, 1], [], []>} : vector<39x64xf32>, vector<64x64xf32>, vector<39x64xf32> -> vector<39x64xf32>
    %c0_59 = arith.constant 0 : index
    %c0_60 = arith.constant 0 : index
    %c0_61 = arith.constant 0 : index
    %53 = vector.load %arg6[%c0_59, %c0_60, %c0_61] : memref<3x64x64xf32, #tpu.memory_space<vmem>>, vector<1x64x64xf32>
    %54 = vector.shape_cast %53 : vector<1x64x64xf32> to vector<64x64xf32>
    %cst_62 = arith.constant dense<0.000000e+00> : vector<39x64xf32>
    %55 = tpu.matmul %49, %54, %cst_62 {dimension_numbers = #tpu.dot_dimension_numbers<[1], [0], [0], [1], [0, 0, 1, 1], [], []>} : vector<39x64xf32>, vector<64x64xf32>, vector<39x64xf32> -> vector<39x64xf32>
    %c1_63 = arith.constant 1 : index
    %c0_64 = arith.constant 0 : index
    %56 = vector.load %arg13[%c1_63, %c0_64] : memref<41x64xf32, #tpu.memory_space<vmem>>, vector<39x64xf32>
    %c1_65 = arith.constant 1 : index
    %c0_66 = arith.constant 0 : index
    %c0_67 = arith.constant 0 : index
    %57 = vector.load %arg5[%c1_65, %c0_66, %c0_67] : memref<3x64x64xf32, #tpu.memory_space<vmem>>, vector<1x64x64xf32>
    %58 = vector.shape_cast %57 : vector<1x64x64xf32> to vector<64x64xf32>
    %cst_68 = arith.constant dense<0.000000e+00> : vector<39x64xf32>
    %59 = tpu.matmul %56, %58, %cst_68 {dimension_numbers = #tpu.dot_dimension_numbers<[1], [0], [0], [1], [0, 0, 1, 1], [], []>} : vector<39x64xf32>, vector<64x64xf32>, vector<39x64xf32> -> vector<39x64xf32>
    %60 = arith.addf %52, %59 : vector<39x64xf32>
    %c1_69 = arith.constant 1 : index
    %c0_70 = arith.constant 0 : index
    %c0_71 = arith.constant 0 : index
    %61 = vector.load %arg6[%c1_69, %c0_70, %c0_71] : memref<3x64x64xf32, #tpu.memory_space<vmem>>, vector<1x64x64xf32>
    %62 = vector.shape_cast %61 : vector<1x64x64xf32> to vector<64x64xf32>
    %cst_72 = arith.constant dense<0.000000e+00> : vector<39x64xf32>
    %63 = tpu.matmul %56, %62, %cst_72 {dimension_numbers = #tpu.dot_dimension_numbers<[1], [0], [0], [1], [0, 0, 1, 1], [], []>} : vector<39x64xf32>, vector<64x64xf32>, vector<39x64xf32> -> vector<39x64xf32>
    %64 = arith.addf %55, %63 : vector<39x64xf32>
    %c2_73 = arith.constant 2 : index
    %c0_74 = arith.constant 0 : index
    %65 = vector.load %arg13[%c2_73, %c0_74] : memref<41x64xf32, #tpu.memory_space<vmem>>, vector<39x64xf32>
    %c2_75 = arith.constant 2 : index
    %c0_76 = arith.constant 0 : index
    %c0_77 = arith.constant 0 : index
    %66 = vector.load %arg5[%c2_75, %c0_76, %c0_77] : memref<3x64x64xf32, #tpu.memory_space<vmem>>, vector<1x64x64xf32>
    %67 = vector.shape_cast %66 : vector<1x64x64xf32> to vector<64x64xf32>
    %cst_78 = arith.constant dense<0.000000e+00> : vector<39x64xf32>
    %68 = tpu.matmul %65, %67, %cst_78 {dimension_numbers = #tpu.dot_dimension_numbers<[1], [0], [0], [1], [0, 0, 1, 1], [], []>} : vector<39x64xf32>, vector<64x64xf32>, vector<39x64xf32> -> vector<39x64xf32>
    %69 = arith.addf %60, %68 : vector<39x64xf32>
    %c2_79 = arith.constant 2 : index
    %c0_80 = arith.constant 0 : index
    %c0_81 = arith.constant 0 : index
    %70 = vector.load %arg6[%c2_79, %c0_80, %c0_81] : memref<3x64x64xf32, #tpu.memory_space<vmem>>, vector<1x64x64xf32>
    %71 = vector.shape_cast %70 : vector<1x64x64xf32> to vector<64x64xf32>
    %cst_82 = arith.constant dense<0.000000e+00> : vector<39x64xf32>
    %72 = tpu.matmul %65, %71, %cst_82 {dimension_numbers = #tpu.dot_dimension_numbers<[1], [0], [0], [1], [0, 0, 1, 1], [], []>} : vector<39x64xf32>, vector<64x64xf32>, vector<39x64xf32> -> vector<39x64xf32>
    %73 = arith.addf %64, %72 : vector<39x64xf32>
    %74 = arith.maximumf %69, %73 : vector<39x64xf32>
    %c0_83 = arith.constant 0 : index
    %c0_84 = arith.constant 0 : index
    %75 = vector.load %arg14[%c0_83, %c0_84] : memref<39x64xf32, #tpu.memory_space<vmem>>, vector<39x64xf32>
    tpu.vector_store %arg14[%c0_83, %c0_84], %74 {strides = array<i32>} : memref<39x64xf32, #tpu.memory_space<vmem>>, vector<39x64xf32>,
    %c0_85 = arith.constant 0 : index
    %c0_86 = arith.constant 0 : index
    %76 = tpu.strided_load %arg14[%c0_85, %c0_86] {strides = array<i32: 2, 1>} : memref<39x64xf32, #tpu.memory_space<vmem>>, vector<19x64xf32>
    %c1_87 = arith.constant 1 : index
    %c0_88 = arith.constant 0 : index
    %77 = tpu.strided_load %arg14[%c1_87, %c0_88] {strides = array<i32: 2, 1>} : memref<39x64xf32, #tpu.memory_space<vmem>>, vector<19x64xf32>
    %78 = arith.maximumf %76, %77 : vector<19x64xf32>
    %c0_89 = arith.constant 0 : index
    %c0_90 = arith.constant 0 : index
    %79 = vector.load %arg7[%c0_89, %c0_90] : memref<1x64xf32, #tpu.memory_space<vmem>>, vector<1x64xf32>
    %80 = vector.broadcast %79 : vector<1x64xf32> to vector<19x64xf32>
    %81 = arith.addf %78, %80 : vector<19x64xf32>
    %cst_91 = arith.constant 0.000000e+00 : f32
    %82 = vector.broadcast %cst_91 : f32 to vector<19x64xf32>
    %83 = arith.maximumf %81, %82 : vector<19x64xf32>
    %c0_92 = arith.constant 0 : index
    %c0_93 = arith.constant 0 : index
    %84 = vector.load %arg15[%c0_92, %c0_93] : memref<19x64xf32, #tpu.memory_space<vmem>>, vector<19x64xf32>
    tpu.vector_store %arg15[%c0_92, %c0_93], %83 {strides = array<i32>} : memref<19x64xf32, #tpu.memory_space<vmem>>, vector<19x64xf32>,
    %c0_94 = arith.constant 0 : index
    %c0_95 = arith.constant 0 : index
    %85 = tpu.strided_load %arg15[%c0_94, %c0_95] {strides = array<i32: 5, 1>} : memref<19x64xf32, #tpu.memory_space<vmem>>, vector<4x64xf32>
    %c0_96 = arith.constant 0 : index
    %c0_97 = arith.constant 0 : index
    %c0_98 = arith.constant 0 : index
    %86 = vector.load %arg8[%c0_96, %c0_97, %c0_98] : memref<4x64x32xf32, #tpu.memory_space<vmem>>, vector<1x64x32xf32>
    %87 = vector.shape_cast %86 : vector<1x64x32xf32> to vector<64x32xf32>
    %cst_99 = arith.constant dense<0.000000e+00> : vector<4x32xf32>
    %88 = tpu.matmul %85, %87, %cst_99 {dimension_numbers = #tpu.dot_dimension_numbers<[1], [0], [0], [1], [0, 0, 1, 1], [], []>} : vector<4x64xf32>, vector<64x32xf32>, vector<4x32xf32> -> vector<4x32xf32>
    %c1_100 = arith.constant 1 : index
    %c0_101 = arith.constant 0 : index
    %89 = tpu.strided_load %arg15[%c1_100, %c0_101] {strides = array<i32: 5, 1>} : memref<19x64xf32, #tpu.memory_space<vmem>>, vector<4x64xf32>
    %c1_102 = arith.constant 1 : index
    %c0_103 = arith.constant 0 : index
    %c0_104 = arith.constant 0 : index
    %90 = vector.load %arg8[%c1_102, %c0_103, %c0_104] : memref<4x64x32xf32, #tpu.memory_space<vmem>>, vector<1x64x32xf32>
    %91 = vector.shape_cast %90 : vector<1x64x32xf32> to vector<64x32xf32>
    %cst_105 = arith.constant dense<0.000000e+00> : vector<4x32xf32>
    %92 = tpu.matmul %89, %91, %cst_105 {dimension_numbers = #tpu.dot_dimension_numbers<[1], [0], [0], [1], [0, 0, 1, 1], [], []>} : vector<4x64xf32>, vector<64x32xf32>, vector<4x32xf32> -> vector<4x32xf32>
    %93 = arith.addf %88, %92 : vector<4x32xf32>
    %c2_106 = arith.constant 2 : index
    %c0_107 = arith.constant 0 : index
    %94 = tpu.strided_load %arg15[%c2_106, %c0_107] {strides = array<i32: 5, 1>} : memref<19x64xf32, #tpu.memory_space<vmem>>, vector<4x64xf32>
    %c2_108 = arith.constant 2 : index
    %c0_109 = arith.constant 0 : index
    %c0_110 = arith.constant 0 : index
    %95 = vector.load %arg8[%c2_108, %c0_109, %c0_110] : memref<4x64x32xf32, #tpu.memory_space<vmem>>, vector<1x64x32xf32>
    %96 = vector.shape_cast %95 : vector<1x64x32xf32> to vector<64x32xf32>
    %cst_111 = arith.constant dense<0.000000e+00> : vector<4x32xf32>
    %97 = tpu.matmul %94, %96, %cst_111 {dimension_numbers = #tpu.dot_dimension_numbers<[1], [0], [0], [1], [0, 0, 1, 1], [], []>} : vector<4x64xf32>, vector<64x32xf32>, vector<4x32xf32> -> vector<4x32xf32>
    %98 = arith.addf %93, %97 : vector<4x32xf32>
    %c3 = arith.constant 3 : index
    %c0_112 = arith.constant 0 : index
    %99 = tpu.strided_load %arg15[%c3, %c0_112] {strides = array<i32: 5, 1>} : memref<19x64xf32, #tpu.memory_space<vmem>>, vector<4x64xf32>
    %c3_113 = arith.constant 3 : index
    %c0_114 = arith.constant 0 : index
    %c0_115 = arith.constant 0 : index
    %100 = vector.load %arg8[%c3_113, %c0_114, %c0_115] : memref<4x64x32xf32, #tpu.memory_space<vmem>>, vector<1x64x32xf32>
    %101 = vector.shape_cast %100 : vector<1x64x32xf32> to vector<64x32xf32>
    %cst_116 = arith.constant dense<0.000000e+00> : vector<4x32xf32>
    %102 = tpu.matmul %99, %101, %cst_116 {dimension_numbers = #tpu.dot_dimension_numbers<[1], [0], [0], [1], [0, 0, 1, 1], [], []>} : vector<4x64xf32>, vector<64x32xf32>, vector<4x32xf32> -> vector<4x32xf32>
    %103 = arith.addf %98, %102 : vector<4x32xf32>
    %c0_117 = arith.constant 0 : index
    %c0_118 = arith.constant 0 : index
    %104 = vector.load %arg9[%c0_117, %c0_118] : memref<1x32xf32, #tpu.memory_space<vmem>>, vector<1x32xf32>
    %105 = vector.broadcast %104 : vector<1x32xf32> to vector<4x32xf32>
    %106 = arith.addf %103, %105 : vector<4x32xf32>
    %c0_119 = arith.constant 0 : index
    %c0_120 = arith.constant 0 : index
    %c0_121 = arith.constant 0 : index
    %107 = vector.load %arg10[%c0_119, %c0_120, %c0_121] : memref<1x4x32xf32, #tpu.memory_space<vmem>>, vector<1x4x32xf32>
    %108 = vector.shape_cast %107 : vector<1x4x32xf32> to vector<4x32xf32>
    %109 = vector.shape_cast %106 : vector<4x32xf32> to vector<1x4x32xf32>
    tpu.vector_store %arg10[%c0_119, %c0_120, %c0_121], %109 {strides = array<i32>} : memref<1x4x32xf32, #tpu.memory_space<vmem>>, vector<1x4x32xf32>,
    return
  }
  func.func @transform_0(%arg0: i32) -> (i32, i32, i32) {
    %c0_i32 = arith.constant 0 : i32
    %c0_i32_0 = arith.constant 0 : i32
    %c0_i32_1 = arith.constant 0 : i32
    return %arg0, %c0_i32, %c0_i32_0 : i32, i32, i32
  }
  func.func @transform_1(%arg0: i32) -> (i32, i32, i32) {
    %c0_i32 = arith.constant 0 : i32
    %c0_i32_0 = arith.constant 0 : i32
    %c0_i32_1 = arith.constant 0 : i32
    %c0_i32_2 = arith.constant 0 : i32
    return %c0_i32, %c0_i32_0, %c0_i32_1 : i32, i32, i32
  }
  func.func @transform_2(%arg0: i32) -> (i32, i32, i32) {
    %c0_i32 = arith.constant 0 : i32
    %c0_i32_0 = arith.constant 0 : i32
    %c0_i32_1 = arith.constant 0 : i32
    %c0_i32_2 = arith.constant 0 : i32
    return %c0_i32, %c0_i32_0, %c0_i32_1 : i32, i32, i32
  }
  func.func @transform_3(%arg0: i32) -> (i32, i32) {
    %c0_i32 = arith.constant 0 : i32
    %c0_i32_0 = arith.constant 0 : i32
    %c0_i32_1 = arith.constant 0 : i32
    return %c0_i32, %c0_i32_0 : i32, i32
  }
  func.func @transform_4(%arg0: i32) -> (i32, i32, i32) {
    %c0_i32 = arith.constant 0 : i32
    %c0_i32_0 = arith.constant 0 : i32
    %c0_i32_1 = arith.constant 0 : i32
    %c0_i32_2 = arith.constant 0 : i32
    return %c0_i32, %c0_i32_0, %c0_i32_1 : i32, i32, i32
  }
  func.func @transform_5(%arg0: i32) -> (i32, i32, i32) {
    %c0_i32 = arith.constant 0 : i32
    %c0_i32_0 = arith.constant 0 : i32
    %c0_i32_1 = arith.constant 0 : i32
    %c0_i32_2 = arith.constant 0 : i32
    return %c0_i32, %c0_i32_0, %c0_i32_1 : i32, i32, i32
  }
  func.func @transform_6(%arg0: i32) -> (i32, i32) {
    %c0_i32 = arith.constant 0 : i32
    %c0_i32_0 = arith.constant 0 : i32
    %c0_i32_1 = arith.constant 0 : i32
    return %c0_i32, %c0_i32_0 : i32, i32
  }
  func.func @transform_7(%arg0: i32) -> (i32, i32, i32) {
    %c0_i32 = arith.constant 0 : i32
    %c0_i32_0 = arith.constant 0 : i32
    %c0_i32_1 = arith.constant 0 : i32
    %c0_i32_2 = arith.constant 0 : i32
    return %c0_i32, %c0_i32_0, %c0_i32_1 : i32, i32, i32
  }
  func.func @transform_8(%arg0: i32) -> (i32, i32) {
    %c0_i32 = arith.constant 0 : i32
    %c0_i32_0 = arith.constant 0 : i32
    %c0_i32_1 = arith.constant 0 : i32
    return %c0_i32, %c0_i32_0 : i32, i32
  }
  func.func @transform_9(%arg0: i32) -> (i32, i32, i32) {
    %c0_i32 = arith.constant 0 : i32
    %c0_i32_0 = arith.constant 0 : i32
    %c0_i32_1 = arith.constant 0 : i32
    return %arg0, %c0_i32, %c0_i32_0 : i32, i32, i32
  }
}

</mosaic_0001>

<bundles_post_ra>
// kernel: siamese_forward.1
= control target key start
LH: loop header
LB: loop body
LE: loop exit
PB: predicated region body
PF: predicated region fallthrough
CT: control target
= control target key end

     0   :  { %vm75_vm0 = vcmask 523264   ;;  %v2921_v0 = vmov 0.0   ;;  %vm2922_vm1 = vmmov 0   ;;  %vm942_vm2 = vcmask 516096   ;;  %s4020_s1 = inlined_call_operand.vmem [shape: f32[3,64,64], index: 1, kind: input, shape index: {}]   ;;  %s4021_s0 = inlined_call_operand.vmem [shape: f32[1,73,64], index: 0, kind: input, shape index: {}]   ;;  %s4022_s2 = inlined_call_operand.vmem [shape: f32[3,64,64], index: 2, kind: input, shape index: {}]   ;;  %s4023_s4 = inlined_call_operand.vmem [shape: f32[3,64,64], index: 4, kind: input, shape index: {}]   ;;  %s4024_s3 = inlined_call_operand.vmem [shape: f32[1,64], index: 3, kind: input, shape index: {}]   ;;  %s4025_s5 = inlined_call_operand.vmem [shape: f32[3,64,64], index: 5, kind: input, shape index: {}]   ;;  %s4026_s7 = inlined_call_operand.vmem [shape: f32[4,64,32], index: 7, kind: input, shape index: {}]   ;;  %s4027_s6 = inlined_call_operand.vmem [shape: f32[1,64], index: 6, kind: input, shape index: {}]   ;;  %s4028_s8 = inlined_call_operand.vmem [shape: f32[1,32], index: 8, kind: input, shape index: {}]   ;;  %s4029_s9 = inlined_call_operand.vmem [shape: f32[1,4,32], index: 9, kind: output, shape index: {}]  }
   0x1   :  { %2399 = vmatprep.subr.mxu0 %v2921_v0  ;;  %2442 = vmatprep.subr.mxu1 %v2921_v0  ;;  %v2011_v1 = vld [vmem:[%s4020_s1 + $0x78] sm:$0xff]  ;;  %v2010_v3 = vld [vmem:[%s4020_s1 + $0x70] sm:$0xff]  ;;  %937 = vst.msk [vmem:[#allocation4] sm:$0xff] %vm75_vm0, %v2921_v0  ;;  %938 = vst.msk [vmem:[#allocation4 + $0x8] sm:$0xff] %vm75_vm0, %v2921_v0  ;;  %vm888_vm3 = vcmask 522240   ;;  %vm935_vm4 = vcmask 518144  }
   0x2   :  { %v48_v2 = vld [vmem:[%s4020_s1 + $0x38] sm:$0xff]  ;;  %939 = vst.msk [vmem:[#allocation4 + $0x10] sm:$0xff] %vm75_vm0, %v2921_v0  ;;  %940 = vst.msk [vmem:[#allocation4 + $0x18] sm:$0xff] %vm75_vm0, %v2921_v0  ;;  %2400 = vmatpush3.msra.mxu0 %v2011_v1  ;;  %v47_v4 = vld [vmem:[%s4020_s1 + $0x30] sm:$0xff]  ;;  %2415 = vmatprep.mubr.msk.f32.mxu0 %vm2922_vm1, %v2921_v0  ;;  %vm1998_vm5 = vcmask 257024  }
   0x3   :  { %941 = vst.msk [vmem:[#allocation4 + $0x20] sm:$0xff] %vm75_vm0, %v2921_v0  ;;  %2443 = vmatpush3.msra.mxu1 %v48_v2  ;;  %2401 = vmatprep.subr.mxu0 %v2921_v0  ;;  %v2009_v5 = vld [vmem:[%s4020_s1 + $0x68] sm:$0xff]  ;;  %v2008_v7 = vld [vmem:[%s4020_s1 + $0x60] sm:$0xff]  ;;  %v2007_v9 = vld [vmem:[%s4020_s1 + $0x58] sm:$0xff] }
   0x4   :  { %2444 = vmatprep.subr.mxu1 %v2921_v0  ;;  %v46_v6 = vld [vmem:[%s4020_s1 + $0x28] sm:$0xff]  ;;  %2402 = vmatpush3.msra.mxu0 %v2010_v3  ;;  %v45_v8 = vld [vmem:[%s4020_s1 + $0x20] sm:$0xff]  ;;  %v44_v10 = vld [vmem:[%s4020_s1 + $0x18] sm:$0xff]  ;;  %943 = vst.msk [vmem:[#allocation4 + $0x28] sm:$0x1] %vm942_vm2, %v2921_v0 }
   0x5   :  { %2445 = vmatpush3.msra.mxu1 %v47_v4  ;;  %2403 = vmatprep.subr.mxu0 %v2921_v0  ;;  %v2006_v11 = vld [vmem:[%s4020_s1 + $0x50] sm:$0xff]  ;;  %v2005_v13 = vld [vmem:[%s4020_s1 + $0x48] sm:$0xff]  ;;  %v2004_v15 = vld [vmem:[%s4020_s1 + $0x40] sm:$0xff] }
   0x6   :  { %2446 = vmatprep.subr.mxu1 %v2921_v0  ;;  %2404 = vmatpush3.msra.mxu0 %v2009_v5  ;;  %v43_v12 = vld [vmem:[%s4020_s1 + $0x10] sm:$0xff]  ;;  %v42_v14 = vld [vmem:[%s4020_s1 + $0x8] sm:$0xff]  ;;  %v41_v16 = vld [vmem:[%s4020_s1] sm:$0xff] }
   0x7   :  { %2447 = vmatpush3.msra.mxu1 %v46_v6  ;;  %2405 = vmatprep.subr.mxu0 %v2921_v0  ;;  %v3050_v17 = vld [vmem:[%s4021_s0 + $0x1] sm:$0xff]  ;;  %v2037_v19 = vld [vmem:[%s4022_s2 + $0x78] sm:$0xff]  ;;  %v3076_v21 = vld [vmem:[%s4021_s0 + $0x9] sm:$0xff] }
   0x8   :  { %2448 = vmatprep.subr.mxu1 %v2921_v0  ;;  %2406 = vmatpush3.msra.mxu0 %v2008_v7  ;;  %v3055_v18 = vld [vmem:[%s4021_s0] sm:$0xff]  ;;  %v56_v20 = vld [vmem:[%s4022_s2 + $0x38] sm:$0xff]  ;;  %v3081_v22 = vld [vmem:[%s4021_s0 + $0x8] sm:$0xff] }
   0x9   :  { %2449 = vmatpush3.msra.mxu1 %v45_v8  ;;  %2407 = vmatprep.subr.mxu0 %v2921_v0  ;;  %v2036_v23 = vld [vmem:[%s4022_s2 + $0x70] sm:$0xff]  ;;  %v2035_v27 = vld [vmem:[%s4022_s2 + $0x68] sm:$0xff]  ;;  %v3128_v29 = vld [vmem:[%s4021_s0 + $0x19] sm:$0xff] }
   0xa   :  { %2450 = vmatprep.subr.mxu1 %v2921_v0  ;;  %2408 = vmatpush3.msra.mxu0 %v2007_v9  ;;  %v55_v24 = vld [vmem:[%s4022_s2 + $0x30] sm:$0xff]  ;;  %v54_v28 = vld [vmem:[%s4022_s2 + $0x28] sm:$0xff]  ;;  %v3133_v30 = vld [vmem:[%s4021_s0 + $0x18] sm:$0xff] }
   0xb   :  { %2451 = vmatpush3.msra.mxu1 %v44_v10  ;;  %2409 = vmatprep.subr.mxu0 %v2921_v0  ;;  %v3102_v25 = vld [vmem:[%s4021_s0 + $0x11] sm:$0xff]  ;;  %v2034_v31 = vld [vmem:[%s4022_s2 + $0x60] sm:$0xff]  ;;  %v3180_v37 = vld [vmem:[%s4021_s0 + $0x29] sm:$0xff] }
   0xc   :  { %2452 = vmatprep.subr.mxu1 %v2921_v0  ;;  %2410 = vmatpush3.msra.mxu0 %v2006_v11  ;;  %v3107_v26 = vld [vmem:[%s4021_s0 + $0x10] sm:$0xff]  ;;  %v53_v32 = vld [vmem:[%s4022_s2 + $0x20] sm:$0xff]  ;;  %v2033_v35 = vld [vmem:[%s4022_s2 + $0x58] sm:$0xff] }
   0xd   :  { %2453 = vmatpush3.msra.mxu1 %v43_v12  ;;  %2411 = vmatprep.subr.mxu0 %v2921_v0  ;;  %v3154_v33 = vld [vmem:[%s4021_s0 + $0x21] sm:$0xff]  ;;  %v52_v36 = vld [vmem:[%s4022_s2 + $0x18] sm:$0xff]  ;;  %v2032_v39 = vld [vmem:[%s4022_s2 + $0x50] sm:$0xff] }
   0xe   :  { %2454 = vmatprep.subr.mxu1 %v2921_v0  ;;  %2412 = vmatpush3.msra.mxu0 %v2005_v13  ;;  %v3159_v34 = vld [vmem:[%s4021_s0 + $0x20] sm:$0xff]  ;;  %v3185_v38 = vld [vmem:[%s4021_s0 + $0x28] sm:$0xff]  ;;  %v51_v40 = vld [vmem:[%s4022_s2 + $0x10] sm:$0xff] }
   0xf   :  { %2455 = vmatpush3.msra.mxu1 %v42_v14  ;;  %2413 = vmatprep.subr.mxu0 %v2921_v0  ;;  %v3208_v41 = vld [vmem:[%s4021_s0 + $0x31] sm:$0xff]  ;;  %v2031_v43 = vld [vmem:[%s4022_s2 + $0x48] sm:$0xff]  ;;  %v3234_v45 = vld [vmem:[%s4021_s0 + $0x39] sm:$0xff] }
  0x10   :  { %2456 = vmatprep.subr.mxu1 %v2921_v0  ;;  %2414 = vmatpush3.msra.mxu0 %v2004_v15  ;;  %v3213_v42 = vld [vmem:[%s4021_s0 + $0x30] sm:$0xff]  ;;  %v50_v44 = vld [vmem:[%s4022_s2 + $0x8] sm:$0xff]  ;;  %v3239_v46 = vld [vmem:[%s4021_s0 + $0x38] sm:$0xff] }
  0x11   :  { %2457 = vmatpush3.msra.mxu1 %v41_v16  ;;  %2458 = vmatprep.mubr.msk.f32.mxu1 %vm2922_vm1, %v2921_v0  ;;  %v2030_v47 = vld [vmem:[%s4022_s2 + $0x40] sm:$0xff]  ;;  %v2063_v51 = vld [vmem:[%s4020_s1 + $0xb8] sm:$0xff]  ;;  %v2062_v53 = vld [vmem:[%s4020_s1 + $0xb0] sm:$0xff] }
  0x12   :  { %2416 = vmatmul.mubr.msk.f32.vlgmr.msra.gmra.mxu0 %vm75_vm0, %v3050_v17  ;;  %2459 = vmatmul.mubr.msk.f32.vlgmr.msra.gmra.mxu1 %vm75_vm0, %v3055_v18  ;;  %v49_v48 = vld [vmem:[%s4022_s2] sm:$0xff]  ;;  %v2080_v52 = vld [vmem:[%s4022_s2 + $0xb8] sm:$0xff]  ;;  %v2079_v54 = vld [vmem:[%s4022_s2 + $0xb0] sm:$0xff] }
  0x13   :  { %2485 = vmatprep.subr.mxu0 %v2921_v0  ;;  %2528 = vmatprep.subr.mxu1 %v2921_v0  ;;  %v3260_v49 = vld [vmem:[%s4021_s0 + $0x41] sm:$0x7f]  ;;  %v2061_v55 = vld [vmem:[%s4020_s1 + $0xa8] sm:$0xff]  ;;  %v2059_v59 = vld [vmem:[%s4020_s1 + $0x98] sm:$0xff] }
  0x14   :  { %2486 = vmatpush3.msra.mxu0 %v2037_v19  ;;  %2529 = vmatpush3.msra.mxu1 %v56_v20  ;;  %v3265_v50 = vld [vmem:[%s4021_s0 + $0x40] sm:$0x7f]  ;;  %v2078_v56 = vld [vmem:[%s4022_s2 + $0xa8] sm:$0xff]  ;;  %v2076_v60 = vld [vmem:[%s4022_s2 + $0x98] sm:$0xff] }
  0x15   :  { %2418 = vmatprep.mubr.msk.f32.mxu0 %vm2922_vm1, %v2921_v0  ;;  %2461 = vmatprep.mubr.msk.f32.mxu1 %vm2922_vm1, %v2921_v0  ;;  %v2060_v57 = vld [vmem:[%s4020_s1 + $0xa0] sm:$0xff]  ;;  %v2058_v61 = vld [vmem:[%s4020_s1 + $0x90] sm:$0xff]  ;;  %v2057_v63 = vld [vmem:[%s4020_s1 + $0x88] sm:$0xff] }
  0x16   :  { %2419 = vmatmul.mubr.msk.f32.gmra.mxu0 %vm75_vm0, %v3076_v21  ;;  %2462 = vmatmul.mubr.msk.f32.gmra.mxu1 %vm75_vm0, %v3081_v22  ;;  %v2077_v58 = vld [vmem:[%s4022_s2 + $0xa0] sm:$0xff]  ;;  %v2075_v62 = vld [vmem:[%s4022_s2 + $0x90] sm:$0xff]  ;;  %v2074_v1 = vld [vmem:[%s4022_s2 + $0x88] sm:$0xff] }
  0x17   :  { %2487 = vmatprep.subr.mxu0 %v2921_v0  ;;  %2530 = vmatprep.subr.mxu1 %v2921_v0  ;;  %v2056_v2 = vld [vmem:[%s4020_s1 + $0x80] sm:$0xff]  ;;  %v580_v5 = vld [vmem:[%s4021_s0 + $0xa] sm:$0xff]  ;;  %v581_v6 = vld [vmem:[%s4021_s0 + $0x12] sm:$0xff] }
  0x18   :  { %2488 = vmatpush3.msra.mxu0 %v2036_v23  ;;  %2531 = vmatpush3.msra.mxu1 %v55_v24  ;;  %v2073_v3 = vld [vmem:[%s4022_s2 + $0x80] sm:$0xff]  ;;  %v584_v9 = vld [vmem:[%s4021_s0 + $0x2a] sm:$0xff]  ;;  %v585_v10 = vld [vmem:[%s4021_s0 + $0x32] sm:$0xff] }
  0x19   :  { %2421 = vmatprep.mubr.msk.f32.mxu0 %vm2922_vm1, %v2921_v0  ;;  %2464 = vmatprep.mubr.msk.f32.mxu1 %vm2922_vm1, %v2921_v0  ;;  %v579_v4 = vld [vmem:[%s4021_s0 + $0x2] sm:$0xff]  ;;  %v582_v7 = vld [vmem:[%s4021_s0 + $0x1a] sm:$0xff]  ;;  %v2097_v15 = vld [vmem:[%s4023_s4 + $0x70] sm:$0xff] }
  0x1a   :  { %2422 = vmatmul.mubr.msk.f32.gmra.mxu0 %vm75_vm0, %v3102_v25  ;;  %2465 = vmatmul.mubr.msk.f32.gmra.mxu1 %vm75_vm0, %v3107_v26  ;;  %v583_v8 = vld [vmem:[%s4021_s0 + $0x22] sm:$0xff]  ;;  %v586_v11 = vld [vmem:[%s4021_s0 + $0x3a] sm:$0xff]  ;;  %v963_v16 = vld [vmem:[%s4023_s4 + $0x30] sm:$0xff] }
  0x1b   :  { %2489 = vmatprep.subr.mxu0 %v2921_v0  ;;  %2532 = vmatprep.subr.mxu1 %v2921_v0  ;;  %v587_v12 = vld [vmem:[%s4021_s0 + $0x42] sm:$0x7f]  ;;  %v2098_v13 = vld [vmem:[%s4023_s4 + $0x78] sm:$0xff]  ;;  %v2093_v23 = vld [vmem:[%s4023_s4 + $0x50] sm:$0xff] }
  0x1c   :  { %2490 = vmatpush3.msra.mxu0 %v2035_v27  ;;  %2533 = vmatpush3.msra.mxu1 %v54_v28  ;;  %v964_v14 = vld [vmem:[%s4023_s4 + $0x38] sm:$0xff]  ;;  %v2095_v19 = vld [vmem:[%s4023_s4 + $0x60] sm:$0xff]  ;;  %v959_v24 = vld [vmem:[%s4023_s4 + $0x10] sm:$0xff] }
  0x1d   :  { %2424 = vmatprep.mubr.msk.f32.mxu0 %vm2922_vm1, %v2921_v0  ;;  %2467 = vmatprep.mubr.msk.f32.mxu1 %vm2922_vm1, %v2921_v0  ;;  %v961_v20 = vld [vmem:[%s4023_s4 + $0x20] sm:$0xff] }
  0x1e   :  { %2425 = vmatmul.mubr.msk.f32.gmra.mxu0 %vm75_vm0, %v3128_v29  ;;  %2468 = vmatmul.mubr.msk.f32.gmra.mxu1 %vm75_vm0, %v3133_v30  ;;  %v2091_v27 = vld [vmem:[%s4023_s4 + $0x40] sm:$0xff] }
  0x1f   :  { %2491 = vmatprep.subr.mxu0 %v2921_v0  ;;  %2534 = vmatprep.subr.mxu1 %v2921_v0  ;;  %v957_v28 = vld [vmem:[%s4023_s4] sm:$0xff] }
  0x20   :  { %2427 = vmatprep.mubr.msk.f32.mxu0 %vm2922_vm1, %v2921_v0  ;;  %2470 = vmatprep.mubr.msk.f32.mxu1 %vm2922_vm1, %v2921_v0 }
  0x21   :  { %2492 = vmatpush3.msra.mxu0 %v2034_v31  ;;  %2535 = vmatpush3.msra.mxu1 %v53_v32 }
  0x22   :  { %2428 = vmatmul.mubr.msk.f32.gmra.mxu0 %vm75_vm0, %v3154_v33  ;;  %2471 = vmatmul.mubr.msk.f32.gmra.mxu1 %vm75_vm0, %v3159_v34 }
  0x23   :  { %2493 = vmatprep.subr.mxu0 %v2921_v0  ;;  %2536 = vmatprep.subr.mxu1 %v2921_v0 }
  0x24   :  { %2430 = vmatprep.mubr.msk.f32.mxu0 %vm2922_vm1, %v2921_v0  ;;  %2473 = vmatprep.mubr.msk.f32.mxu1 %vm2922_vm1, %v2921_v0 }
  0x25   :  { %2494 = vmatpush3.msra.mxu0 %v2033_v35  ;;  %2537 = vmatpush3.msra.mxu1 %v52_v36 }
  0x26   :  { %2431 = vmatmul.mubr.msk.f32.gmra.mxu0 %vm75_vm0, %v3180_v37  ;;  %2474 = vmatmul.mubr.msk.f32.gmra.mxu1 %vm75_vm0, %v3185_v38 }
  0x27   :  { %2433 = vmatprep.mubr.msk.f32.mxu0 %vm2922_vm1, %v2921_v0  ;;  %2476 = vmatprep.mubr.msk.f32.mxu1 %vm2922_vm1, %v2921_v0 }
  0x28   :  { %2495 = vmatprep.subr.mxu0 %v2921_v0  ;;  %2538 = vmatprep.subr.mxu1 %v2921_v0 }
  0x29   :  { %2496 = vmatpush3.msra.mxu0 %v2032_v39  ;;  %2539 = vmatpush3.msra.mxu1 %v51_v40 }
  0x2a   :  { %2434 = vmatmul.mubr.msk.f32.gmra.mxu0 %vm75_vm0, %v3208_v41  ;;  %2477 = vmatmul.mubr.msk.f32.gmra.mxu1 %vm75_vm0, %v3213_v42 }
  0x2b   :  { %2436 = vmatprep.mubr.msk.f32.mxu0 %vm2922_vm1, %v2921_v0  ;;  %2479 = vmatprep.mubr.msk.f32.mxu1 %vm2922_vm1, %v2921_v0 }
  0x2c   :  { %2497 = vmatprep.subr.mxu0 %v2921_v0  ;;  %2540 = vmatprep.subr.mxu1 %v2921_v0 }
  0x2d   :  { %2498 = vmatpush3.msra.mxu0 %v2031_v43  ;;  %2541 = vmatpush3.msra.mxu1 %v50_v44 }
  0x2e   :  { %2437 = vmatmul.mubr.msk.f32.gmra.mxu0 %vm75_vm0, %v3234_v45  ;;  %2480 = vmatmul.mubr.msk.f32.gmra.mxu1 %vm75_vm0, %v3239_v46 }
  0x2f   :  { %2439 = vmatprep.mubr.msk.f32.mxu0 %vm2922_vm1, %v2921_v0  ;;  %2482 = vmatprep.mubr.msk.f32.mxu1 %vm2922_vm1, %v2921_v0 }
  0x30   :  { %2499 = vmatprep.subr.mxu0 %v2921_v0  ;;  %2542 = vmatprep.subr.mxu1 %v2921_v0 }
  0x31   :  { %2500 = vmatpush3.msra.mxu0 %v2030_v47  ;;  %2543 = vmatpush3.msra.mxu1 %v49_v48 }
  0x32   :  { %2440 = vmatmul.mubr.msk.f32.gmra.mxu0 %vm75_vm0, %v3260_v49  ;;  %2483 = vmatmul.mubr.msk.f32.gmra.mxu1 %vm75_vm0, %v3265_v50 }
  0x33   :  { %2501 = vmatprep.mubr.msk.f32.mxu0 %vm2922_vm1, %v2921_v0  ;;  %2544 = vmatprep.mubr.msk.f32.mxu1 %vm2922_vm1, %v2921_v0 }
  0x34   :  { %2571 = vmatprep.subr.mxu0 %v2921_v0  ;;  %2614 = vmatprep.subr.mxu1 %v2921_v0 }
  0x36   :  { %2502 = vmatmul.mubr.msk.f32.vlgmr.msra.gmra.mxu0 %vm75_vm0, %v3050_v17  ;;  %2545 = vmatmul.mubr.msk.f32.vlgmr.msra.gmra.mxu1 %vm75_vm0, %v3055_v18  ;;  %v2096_v17 = vld [vmem:[%s4023_s4 + $0x68] sm:$0xff] }
  0x37   :  { %2572 = vmatpush3.msra.mxu0 %v2063_v51  ;;  %2615 = vmatpush3.msra.mxu1 %v2080_v52  ;;  %v962_v18 = vld [vmem:[%s4023_s4 + $0x28] sm:$0xff] }
  0x38   :  { %2504 = vmatprep.mubr.msk.f32.mxu0 %vm2922_vm1, %v2921_v0  ;;  %2547 = vmatprep.mubr.msk.f32.mxu1 %vm2922_vm1, %v2921_v0 }
  0x39   :  { %2573 = vmatprep.subr.mxu0 %v2921_v0  ;;  %2616 = vmatprep.subr.mxu1 %v2921_v0 }
  0x3a   :  { %2505 = vmatmul.mubr.msk.f32.gmra.mxu0 %vm75_vm0, %v3076_v21  ;;  %2548 = vmatmul.mubr.msk.f32.gmra.mxu1 %vm75_vm0, %v3081_v22  ;;  %v2094_v21 = vld [vmem:[%s4023_s4 + $0x58] sm:$0xff] }
  0x3b   :  { %2574 = vmatpush3.msra.mxu0 %v2062_v53  ;;  %2617 = vmatpush3.msra.mxu1 %v2079_v54  ;;  %v960_v22 = vld [vmem:[%s4023_s4 + $0x18] sm:$0xff] }
  0x3c   :  { %2507 = vmatprep.mubr.msk.f32.mxu0 %vm2922_vm1, %v2921_v0  ;;  %2550 = vmatprep.mubr.msk.f32.mxu1 %vm2922_vm1, %v2921_v0 }
  0x3d   :  { %2575 = vmatprep.subr.mxu0 %v2921_v0  ;;  %2618 = vmatprep.subr.mxu1 %v2921_v0 }
  0x3e   :  { %2508 = vmatmul.mubr.msk.f32.gmra.mxu0 %vm75_vm0, %v3102_v25  ;;  %2551 = vmatmul.mubr.msk.f32.gmra.mxu1 %vm75_vm0, %v3107_v26  ;;  %v2092_v25 = vld [vmem:[%s4023_s4 + $0x48] sm:$0xff] }
  0x3f   :  { %2576 = vmatpush3.msra.mxu0 %v2061_v55  ;;  %2619 = vmatpush3.msra.mxu1 %v2078_v56  ;;  %v958_v26 = vld [vmem:[%s4023_s4 + $0x8] sm:$0xff] }
  0x40   :  { %2510 = vmatprep.mubr.msk.f32.mxu0 %vm2922_vm1, %v2921_v0  ;;  %2553 = vmatprep.mubr.msk.f32.mxu1 %vm2922_vm1, %v2921_v0 }
  0x41   :  { %2577 = vmatprep.subr.mxu0 %v2921_v0  ;;  %2620 = vmatprep.subr.mxu1 %v2921_v0 }
  0x42   :  { %2511 = vmatmul.mubr.msk.f32.gmra.mxu0 %vm75_vm0, %v3128_v29  ;;  %2554 = vmatmul.mubr.msk.f32.gmra.mxu1 %vm75_vm0, %v3133_v30 }
  0x43   :  { %2513 = vmatprep.mubr.msk.f32.mxu0 %vm2922_vm1, %v2921_v0  ;;  %2556 = vmatprep.mubr.msk.f32.mxu1 %vm2922_vm1, %v2921_v0 }
  0x44   :  { %2578 = vmatpush3.msra.mxu0 %v2060_v57  ;;  %2621 = vmatpush3.msra.mxu1 %v2077_v58 }
  0x45   :  { %2579 = vmatprep.subr.mxu0 %v2921_v0  ;;  %2622 = vmatprep.subr.mxu1 %v2921_v0 }
  0x46   :  { %2514 = vmatmul.mubr.msk.f32.gmra.mxu0 %vm75_vm0, %v3154_v33  ;;  %2557 = vmatmul.mubr.msk.f32.gmra.mxu1 %vm75_vm0, %v3159_v34 }
  0x47   :  { %2516 = vmatprep.mubr.msk.f32.mxu0 %vm2922_vm1, %v2921_v0  ;;  %2559 = vmatprep.mubr.msk.f32.mxu1 %vm2922_vm1, %v2921_v0 }
  0x48   :  { %2580 = vmatpush3.msra.mxu0 %v2059_v59  ;;  %2623 = vmatpush3.msra.mxu1 %v2076_v60 }
  0x49   :  { %2581 = vmatprep.subr.mxu0 %v2921_v0  ;;  %2624 = vmatprep.subr.mxu1 %v2921_v0 }
  0x4a   :  { %2517 = vmatmul.mubr.msk.f32.gmra.mxu0 %vm75_vm0, %v3180_v37  ;;  %2560 = vmatmul.mubr.msk.f32.gmra.mxu1 %vm75_vm0, %v3185_v38 }
  0x4b   :  { %2519 = vmatprep.mubr.msk.f32.mxu0 %vm2922_vm1, %v2921_v0  ;;  %2562 = vmatprep.mubr.msk.f32.mxu1 %vm2922_vm1, %v2921_v0 }
  0x4c   :  { %2582 = vmatpush3.msra.mxu0 %v2058_v61  ;;  %2625 = vmatpush3.msra.mxu1 %v2075_v62 }
  0x4d   :  { %2583 = vmatprep.subr.mxu0 %v2921_v0  ;;  %2626 = vmatprep.subr.mxu1 %v2921_v0 }
  0x4e   :  { %2520 = vmatmul.mubr.msk.f32.gmra.mxu0 %vm75_vm0, %v3208_v41  ;;  %2563 = vmatmul.mubr.msk.f32.gmra.mxu1 %vm75_vm0, %v3213_v42 }
  0x4f   :  { %2522 = vmatprep.mubr.msk.f32.mxu0 %vm2922_vm1, %v2921_v0  ;;  %2565 = vmatprep.mubr.msk.f32.mxu1 %vm2922_vm1, %v2921_v0 }
  0x50   :  { %2584 = vmatpush3.msra.mxu0 %v2057_v63  ;;  %2627 = vmatpush3.msra.mxu1 %v2074_v1 }
  0x51   :  { %2585 = vmatprep.subr.mxu0 %v2921_v0  ;;  %2628 = vmatprep.subr.mxu1 %v2921_v0 }
  0x52   :  { %2523 = vmatmul.mubr.msk.f32.gmra.mxu0 %vm75_vm0, %v3234_v45  ;;  %2566 = vmatmul.mubr.msk.f32.gmra.mxu1 %vm75_vm0, %v3239_v46 }
  0x53   :  { %2525 = vmatprep.mubr.msk.f32.mxu0 %vm2922_vm1, %v2921_v0  ;;  %2568 = vmatprep.mubr.msk.f32.mxu1 %vm2922_vm1, %v2921_v0 }
  0x54   :  { %2586 = vmatpush3.msra.mxu0 %v2056_v2  ;;  %2629 = vmatpush3.msra.mxu1 %v2073_v3 }
  0x55   :  { %2657 = vmatprep.subr.mxu0 %v2921_v0  ;;  %2688 = vmatprep.subr.mxu1 %v2921_v0 }
  0x56   :  { %2526 = vmatmul.mubr.msk.f32.gmra.mxu0 %vm75_vm0, %v3260_v49  ;;  %2569 = vmatmul.mubr.msk.f32.gmra.mxu1 %vm75_vm0, %v3265_v50 }
  0x57   :  { %2587 = vmatprep.mubr.msk.f32.mxu0 %vm2922_vm1, %v2921_v0  ;;  %2630 = vmatprep.mubr.msk.f32.mxu1 %vm2922_vm1, %v2921_v0 }
  0x5a   :  { %2588 = vmatmul.mubr.msk.f32.vlgmr.msra.gmra.mxu0 %vm75_vm0, %v579_v4  ;;  %2631 = vmatmul.mubr.msk.f32.vlgmr.msra.gmra.mxu1 %vm75_vm0, %v579_v4 }
  0x5b   :  { %2590 = vmatprep.mubr.msk.f32.mxu0 %vm2922_vm1, %v2921_v0  ;;  %2633 = vmatprep.mubr.msk.f32.mxu1 %vm2922_vm1, %v2921_v0 }
  0x5c   :  { %2658 = vmatpush3.msra.mxu0 %v2098_v13  ;;  %2689 = vmatpush3.msra.mxu1 %v964_v14 }
  0x5d   :  { %2659 = vmatprep.subr.mxu0 %v2921_v0  ;;  %2690 = vmatprep.subr.mxu1 %v2921_v0 }
  0x5e   :  { %2591 = vmatmul.mubr.msk.f32.gmra.mxu0 %vm75_vm0, %v580_v5  ;;  %2634 = vmatmul.mubr.msk.f32.gmra.mxu1 %vm75_vm0, %v580_v5 }
  0x5f   :  { %2593 = vmatprep.mubr.msk.f32.mxu0 %vm2922_vm1, %v2921_v0  ;;  %2636 = vmatprep.mubr.msk.f32.mxu1 %vm2922_vm1, %v2921_v0 }
  0x60   :  { %2660 = vmatpush3.msra.mxu0 %v2097_v15  ;;  %2691 = vmatpush3.msra.mxu1 %v963_v16 }
  0x61   :  { %2661 = vmatprep.subr.mxu0 %v2921_v0  ;;  %2692 = vmatprep.subr.mxu1 %v2921_v0 }
  0x62   :  { %2594 = vmatmul.mubr.msk.f32.gmra.mxu0 %vm75_vm0, %v581_v6  ;;  %2637 = vmatmul.mubr.msk.f32.gmra.mxu1 %vm75_vm0, %v581_v6 }
  0x63   :  { %2596 = vmatprep.mubr.msk.f32.mxu0 %vm2922_vm1, %v2921_v0  ;;  %2639 = vmatprep.mubr.msk.f32.mxu1 %vm2922_vm1, %v2921_v0 }
  0x64   :  { %2662 = vmatpush3.msra.mxu0 %v2096_v17  ;;  %2693 = vmatpush3.msra.mxu1 %v962_v18 }
  0x65   :  { %2663 = vmatprep.subr.mxu0 %v2921_v0  ;;  %2694 = vmatprep.subr.mxu1 %v2921_v0 }
  0x66   :  { %2597 = vmatmul.mubr.msk.f32.gmra.mxu0 %vm75_vm0, %v582_v7  ;;  %2640 = vmatmul.mubr.msk.f32.gmra.mxu1 %vm75_vm0, %v582_v7 }
  0x67   :  { %2599 = vmatprep.mubr.msk.f32.mxu0 %vm2922_vm1, %v2921_v0  ;;  %2642 = vmatprep.mubr.msk.f32.mxu1 %vm2922_vm1, %v2921_v0 }
  0x68   :  { %2664 = vmatpush3.msra.mxu0 %v2095_v19  ;;  %2695 = vmatpush3.msra.mxu1 %v961_v20 }
  0x69   :  { %2665 = vmatprep.subr.mxu0 %v2921_v0  ;;  %2696 = vmatprep.subr.mxu1 %v2921_v0 }
  0x6a   :  { %2600 = vmatmul.mubr.msk.f32.gmra.mxu0 %vm75_vm0, %v583_v8  ;;  %2643 = vmatmul.mubr.msk.f32.gmra.mxu1 %vm75_vm0, %v583_v8 }
  0x6b   :  { %2602 = vmatprep.mubr.msk.f32.mxu0 %vm2922_vm1, %v2921_v0  ;;  %2645 = vmatprep.mubr.msk.f32.mxu1 %vm2922_vm1, %v2921_v0 }
  0x6c   :  { %2666 = vmatpush3.msra.mxu0 %v2094_v21  ;;  %2697 = vmatpush3.msra.mxu1 %v960_v22 }
  0x6d   :  { %2667 = vmatprep.subr.mxu0 %v2921_v0  ;;  %2698 = vmatprep.subr.mxu1 %v2921_v0 }
  0x6e   :  { %2603 = vmatmul.mubr.msk.f32.gmra.mxu0 %vm75_vm0, %v584_v9  ;;  %2646 = vmatmul.mubr.msk.f32.gmra.mxu1 %vm75_vm0, %v584_v9 }
  0x6f   :  { %2605 = vmatprep.mubr.msk.f32.mxu0 %vm2922_vm1, %v2921_v0  ;;  %2648 = vmatprep.mubr.msk.f32.mxu1 %vm2922_vm1, %v2921_v0 }
  0x70   :  { %2668 = vmatpush3.msra.mxu0 %v2093_v23  ;;  %2699 = vmatpush3.msra.mxu1 %v959_v24 }
  0x71   :  { %2669 = vmatprep.subr.mxu0 %v2921_v0  ;;  %2700 = vmatprep.subr.mxu1 %v2921_v0 }
  0x72   :  { %2606 = vmatmul.mubr.msk.f32.gmra.mxu0 %vm75_vm0, %v585_v10  ;;  %2649 = vmatmul.mubr.msk.f32.gmra.mxu1 %vm75_vm0, %v585_v10 }
  0x73   :  { %2608 = vmatprep.mubr.msk.f32.mxu0 %vm2922_vm1, %v2921_v0  ;;  %2651 = vmatprep.mubr.msk.f32.mxu1 %vm2922_vm1, %v2921_v0 }
  0x74   :  { %2670 = vmatpush3.msra.mxu0 %v2092_v25  ;;  %2701 = vmatpush3.msra.mxu1 %v958_v26 }
  0x75   :  { %2671 = vmatprep.subr.mxu0 %v2921_v0  ;;  %2702 = vmatprep.subr.mxu1 %v2921_v0 }
  0x76   :  { %2609 = vmatmul.mubr.msk.f32.gmra.mxu0 %vm75_vm0, %v586_v11  ;;  %2652 = vmatmul.mubr.msk.f32.gmra.mxu1 %vm75_vm0, %v586_v11 }
  0x77   :  { %2611 = vmatprep.mubr.msk.f32.mxu0 %vm2922_vm1, %v2921_v0  ;;  %2654 = vmatprep.mubr.msk.f32.mxu1 %vm2922_vm1, %v2921_v0 }
  0x78   :  { %2672 = vmatpush3.msra.mxu0 %v2091_v27  ;;  %2703 = vmatpush3.msra.mxu1 %v957_v28 }
  0x79   :  { %2719 = vmatprep.subr.mxu0 %v2921_v0  ;;  %2750 = vmatprep.subr.mxu1 %v2921_v0 }
  0x7a   :  { %2612 = vmatmul.mubr.msk.f32.gmra.mxu0 %vm75_vm0, %v587_v12  ;;  %2655 = vmatmul.mubr.msk.f32.gmra.mxu1 %vm75_vm0, %v587_v12 }
  0x7b   :  { %2673 = vmatprep.mubr.msk.f32.mxu0 %vm2922_vm1, %v2921_v0  ;;  %2704 = vmatprep.mubr.msk.f32.mxu1 %vm2922_vm1, %v2921_v0 }
  0xd2   :  { %v169_v29 = vpop.f32.mrf.mxu0  ;;  %v306_v30 = vpop.f32.mrf.mxu1 }
  0xd3   :  { %v3560_v31 = vadd.f32 %v306_v30, %v169_v29 }
  0xd4   :  { %v2417_v32 = vpop.f32.mrf.mxu0  ;;  %v2460_v33 = vpop.f32.mrf.mxu1 }
  0xd6   :  { %v174_v34 = vpop.f32.mrf.mxu0  ;;  %v311_v35 = vpop.f32.mrf.mxu1 }
  0xd7   :  { %v3562_v36 = vadd.f32 %v311_v35, %v174_v34 }
  0xd8   :  { %v2420_v37 = vpop.f32.mrf.mxu0  ;;  %v2463_v38 = vpop.f32.mrf.mxu1 }
  0xda   :  { %v179_v39 = vpop.f32.mrf.mxu0  ;;  %v316_v40 = vpop.f32.mrf.mxu1 }
  0xdb   :  { %v3565_v41 = vadd.f32 %v316_v40, %v179_v39 }
  0xdc   :  { %v2423_v42 = vpop.f32.mrf.mxu0  ;;  %v2466_v43 = vpop.f32.mrf.mxu1 }
  0xde   :  { %v184_v44 = vpop.f32.mrf.mxu0  ;;  %v321_v45 = vpop.f32.mrf.mxu1 }
  0xdf   :  { %v3567_v46 = vadd.f32 %v321_v45, %v184_v44 }
  0xe0   :  { %v2426_v47 = vpop.f32.mrf.mxu0  ;;  %v2469_v48 = vpop.f32.mrf.mxu1 }
  0xe2   :  { %v189_v49 = vpop.f32.mrf.mxu0  ;;  %v326_v50 = vpop.f32.mrf.mxu1 }
  0xe3   :  { %v3569_v51 = vadd.f32 %v326_v50, %v189_v49 }
  0xe4   :  { %v2429_v52 = vpop.f32.mrf.mxu0  ;;  %v2472_v53 = vpop.f32.mrf.mxu1 }
  0xe6   :  { %v194_v54 = vpop.f32.mrf.mxu0  ;;  %v331_v55 = vpop.f32.mrf.mxu1 }
  0xe7   :  { %v3571_v56 = vadd.f32 %v331_v55, %v194_v54 }
  0xe8   :  { %v2432_v57 = vpop.f32.mrf.mxu0  ;;  %v2475_v58 = vpop.f32.mrf.mxu1 }
  0xea   :  { %v199_v59 = vpop.f32.mrf.mxu0  ;;  %v336_v60 = vpop.f32.mrf.mxu1 }
  0xeb   :  { %v3573_v61 = vadd.f32 %v336_v60, %v199_v59 }
  0xec   :  { %v2435_v62 = vpop.f32.mrf.mxu0  ;;  %v2478_v63 = vpop.f32.mrf.mxu1 }
  0xee   :  { %v204_v1 = vpop.f32.mrf.mxu0  ;;  %v341_v2 = vpop.f32.mrf.mxu1 }
  0xef   :  { %v3575_v3 = vadd.f32 %v341_v2, %v204_v1 }
  0xf0   :  { %v2438_v4 = vpop.f32.mrf.mxu0  ;;  %v2481_v5 = vpop.f32.mrf.mxu1 }
  0xf2   :  { %v209_v6 = vpop.f32.mrf.mxu0  ;;  %v346_v7 = vpop.f32.mrf.mxu1 }
  0xf3   :  { %v3577_v8 = vadd.f32 %v346_v7, %v209_v6 }
  0xf4   :  { %v2441_v9 = vpop.f32.mrf.mxu0  ;;  %v2484_v10 = vpop.f32.mrf.mxu1 }
  0xf6   :  { %v425_v11 = vpop.f32.mrf.mxu0  ;;  %v535_v12 = vpop.f32.mrf.mxu1 }
  0xf7   :  { %v536_v52 = vadd.f32 %v535_v12, %v425_v11 }
  0xf8   :  { %v2503_v13 = vpop.f32.mrf.mxu0  ;;  %v2546_v14 = vpop.f32.mrf.mxu1 }
  0xfa   :  { %v430_v15 = vpop.f32.mrf.mxu0  ;;  %v540_v16 = vpop.f32.mrf.mxu1 }
  0xfb   :  { %v541_v60 = vadd.f32 %v540_v16, %v430_v15 }
  0xfc   :  { %v2506_v17 = vpop.f32.mrf.mxu0  ;;  %v2549_v18 = vpop.f32.mrf.mxu1 }
  0xfe   :  { %v435_v19 = vpop.f32.mrf.mxu0  ;;  %v545_v20 = vpop.f32.mrf.mxu1 }
  0xff   :  { %v546_v7 = vadd.f32 %v545_v20, %v435_v19 }
 0x100   :  { %v2509_v21 = vpop.f32.mrf.mxu0  ;;  %v2552_v22 = vpop.f32.mrf.mxu1 }
 0x102   :  { %v440_v23 = vpop.f32.mrf.mxu0  ;;  %v550_v24 = vpop.f32.mrf.mxu1 }
 0x103   :  { %v551_v15 = vadd.f32 %v550_v24, %v440_v23 }
 0x104   :  { %v2512_v25 = vpop.f32.mrf.mxu0  ;;  %v2555_v26 = vpop.f32.mrf.mxu1 }
 0x106   :  { %v445_v27 = vpop.f32.mrf.mxu0  ;;  %v555_v28 = vpop.f32.mrf.mxu1 }
 0x107   :  { %v556_v22 = vadd.f32 %v555_v28, %v445_v27 }
 0x108   :  { %v2515_v29 = vpop.f32.mrf.mxu0  ;;  %v2558_v30 = vpop.f32.mrf.mxu1 }
 0x10a   :  { %v3579_v32 = vpop.f32.mrf.mxu0  ;;  %v3581_v33 = vpop.f32.mrf.mxu1 }
 0x10b   :  { %v561_v27 = vadd.f32 %v3581_v33, %v3579_v32 }
 0x10c   :  { %v2518_v34 = vpop.f32.mrf.mxu0  ;;  %v2561_v35 = vpop.f32.mrf.mxu1 }
 0x10e   :  { %v3583_v37 = vpop.f32.mrf.mxu0  ;;  %v3585_v38 = vpop.f32.mrf.mxu1 }
 0x110   :  { %v2521_v39 = vpop.f32.mrf.mxu0  ;;  %v2564_v40 = vpop.f32.mrf.mxu1 }
 0x112   :  { %v3587_v42 = vpop.f32.mrf.mxu0  ;;  %v3589_v43 = vpop.f32.mrf.mxu1 }
 0x114   :  { %v2524_v44 = vpop.f32.mrf.mxu0  ;;  %v2567_v45 = vpop.f32.mrf.mxu1 }
 0x116   :  { %v3591_v47 = vpop.f32.mrf.mxu0  ;;  %v3593_v48 = vpop.f32.mrf.mxu1 }
 0x118   :  { %v2527_v49 = vpop.f32.mrf.mxu0  ;;  %v2570_v50 = vpop.f32.mrf.mxu1 }
 0x11a   :  { %v690_v53 = vpop.f32.mrf.mxu0  ;;  %v818_v54 = vpop.f32.mrf.mxu1 }
 0x11b   :  { %v734_v55 = vadd.f32 %v690_v53, %v3560_v31  ;;  %v862_v57 = vadd.f32 %v818_v54, %v536_v52 }
 0x11c   :  { %v2589_v58 = vpop.f32.mrf.mxu0  ;;  %v2632_v59 = vpop.f32.mrf.mxu1 }
 0x11d   :  { %v871_v62 = vmax.f32 %v734_v55, %v862_v57 }
 0x11e   :  { %v695_v63 = vpop.f32.mrf.mxu0  ;;  %v823_v1 = vpop.f32.mrf.mxu1 }
 0x11f   :  { %880 = vst.msk [vmem:[#allocation2] sm:$0xff] %vm75_vm0, %v871_v62  ;;  %v735_v2 = vadd.f32 %v695_v63, %v3562_v36  ;;  %v863_v4 = vadd.f32 %v823_v1, %v541_v60  ;;  %v571_v1 = vadd.f32 %v3589_v43, %v3587_v42 }
 0x120   :  { %v2592_v5 = vpop.f32.mrf.mxu0  ;;  %v2635_v6 = vpop.f32.mrf.mxu1 }
 0x121   :  { %v872_v9 = vmax.f32 %v735_v2, %v863_v4 }
 0x122   :  { %v700_v10 = vpop.f32.mrf.mxu0  ;;  %v828_v11 = vpop.f32.mrf.mxu1 }
 0x123   :  { %881 = vst.msk [vmem:[#allocation2 + $0x8] sm:$0xff] %vm75_vm0, %v872_v9  ;;  %v736_v31 = vadd.f32 %v700_v10, %v3565_v41  ;;  %v864_v12 = vadd.f32 %v828_v11, %v546_v7  ;;  %v3605_v41 = vld [vmem:[%s4024_s3] ss:$0 sm:$0xff]  ;;  %v576_v11 = vadd.f32 %v3593_v48, %v3591_v47 }
 0x124   :  { %v2595_v13 = vpop.f32.mrf.mxu0  ;;  %v2638_v14 = vpop.f32.mrf.mxu1 }
 0x125   :  { %v873_v16 = vmax.f32 %v736_v31, %v864_v12 }
 0x126   :  { %v705_v17 = vpop.f32.mrf.mxu0  ;;  %v833_v18 = vpop.f32.mrf.mxu1 }
 0x127   :  { %882 = vst.msk [vmem:[#allocation2 + $0x10] sm:$0xff] %vm75_vm0, %v873_v16  ;;  %v737_v36 = vadd.f32 %v705_v17, %v3567_v46  ;;  %v865_v21 = vadd.f32 %v833_v18, %v551_v15 }
 0x128   :  { %v2598_v19 = vpop.f32.mrf.mxu0  ;;  %v2641_v20 = vpop.f32.mrf.mxu1 }
 0x129   :  { %v874_v25 = vmax.f32 %v737_v36, %v865_v21  ;;  %v2116_v36 = vld [vmem:[%s4025_s5 + $0x78] sm:$0xff]  ;;  %v2115_v20 = vld [vmem:[%s4025_s5 + $0x70] sm:$0xff] }
 0x12a   :  { %v890_v26 = vld [vmem:[#allocation2] ss:$2 sm:$0xff]  ;;  %v900_v29 = vld [vmem:[#allocation2 + $0x1] ss:$2 sm:$0xff]  ;;  %v710_v23 = vpop.f32.mrf.mxu0  ;;  %v838_v24 = vpop.f32.mrf.mxu1 }
 0x12b   :  { %v909_v30 = vmax.f32 %v890_v26, %v900_v29  ;;  %883 = vst.msk [vmem:[#allocation2 + $0x18] sm:$0xff] %vm75_vm0, %v874_v25  ;;  %v738_v34 = vadd.f32 %v710_v23, %v3569_v51  ;;  %v866_v46 = vadd.f32 %v838_v24, %v556_v22  ;;  %v566_v51 = vadd.f32 %v3585_v38, %v3583_v37  ;;  %v971_v26 = vld [vmem:[%s4025_s5 + $0x30] sm:$0xff]  ;;  %v2114_v23 = vld [vmem:[%s4025_s5 + $0x68] sm:$0xff] }
 0x12c   :  { %v2601_v35 = vpop.f32.mrf.mxu0  ;;  %v2644_v39 = vpop.f32.mrf.mxu1  ;;  %v970_v24 = vld [vmem:[%s4025_s5 + $0x28] sm:$0xff] }
 0x12d   :  { %v921_v28 = vadd.f32 %v3605_v41, %v909_v30  ;;  %v875_v40 = vmax.f32 %v738_v34, %v866_v46  ;;  %v2113_v34 = vld [vmem:[%s4025_s5 + $0x60] sm:$0xff] }
 0x12e   :  { %v715_v44 = vpop.f32.mrf.mxu0  ;;  %v843_v45 = vpop.f32.mrf.mxu1  ;;  %v969_v46 = vld [vmem:[%s4025_s5 + $0x20] sm:$0xff] }
 0x12f   :  { %v926_v49 = vmax.f32 %v921_v28, 0.0  ;;  %884 = vst.msk [vmem:[#allocation2 + $0x20] sm:$0xff] %vm75_vm0, %v875_v40  ;;  %v739_v50 = vadd.f32 %v715_v44, %v3571_v56  ;;  %v867_v52 = vadd.f32 %v843_v45, %v561_v27  ;;  %v2112_v44 = vld [vmem:[%s4025_s5 + $0x58] sm:$0xff] }
 0x130   :  { %v2604_v53 = vpop.f32.mrf.mxu0  ;;  %v2647_v54 = vpop.f32.mrf.mxu1  ;;  %v968_v45 = vld [vmem:[%s4025_s5 + $0x18] sm:$0xff] }
 0x131   :  { %931 = vst.msk [vmem:[#allocation3] sm:$0xff] %vm75_vm0, %v926_v49  ;;  %v876_v55 = vmax.f32 %v739_v50, %v867_v52  ;;  %v2111_v50 = vld [vmem:[%s4025_s5 + $0x50] sm:$0xff]  ;;  %v966_v54 = vld [vmem:[%s4025_s5 + $0x8] sm:$0xff] }
 0x132   :  { %v892_v32 = vld [vmem:[#allocation2 + $0x10] ss:$2 sm:$0xff]  ;;  %v902_v33 = vld [vmem:[#allocation2 + $0x11] ss:$2 sm:$0xff]  ;;  %v720_v57 = vpop.f32.mrf.mxu0  ;;  %v848_v58 = vpop.f32.mrf.mxu1 }
 0x133   :  { %v910_v59 = vmax.f32 %v892_v32, %v902_v33  ;;  %885 = vst.msk [vmem:[#allocation2 + $0x28] sm:$0xff] %vm75_vm0, %v876_v55  ;;  %v740_v60 = vadd.f32 %v720_v57, %v3573_v61  ;;  %v868_v62 = vadd.f32 %v848_v58, %v566_v51  ;;  %v967_v52 = vld [vmem:[%s4025_s5 + $0x10] sm:$0xff]  ;;  %v2109_v51 = vld [vmem:[%s4025_s5 + $0x40] sm:$0xff] }
 0x134   :  { %v2607_v56 = vpop.f32.mrf.mxu0  ;;  %v2650_v63 = vpop.f32.mrf.mxu1  ;;  %v965_v55 = vld [vmem:[%s4025_s5] sm:$0xff] }
 0x135   :  { %v922_v37 = vadd.f32 %v3605_v41, %v910_v59  ;;  %v877_v38 = vmax.f32 %v740_v60, %v868_v62 }
 0x136   :  { %v725_v2 = vpop.f32.mrf.mxu0  ;;  %v853_v4 = vpop.f32.mrf.mxu1 }
 0x137   :  { %v927_v5 = vmax.f32 %v922_v37, 0.0  ;;  %886 = vst.msk [vmem:[#allocation2 + $0x30] sm:$0xff] %vm75_vm0, %v877_v38  ;;  %v741_v6 = vadd.f32 %v725_v2, %v3575_v3  ;;  %v869_v7 = vadd.f32 %v853_v4, %v571_v1  ;;  %v2134_v37 = vld [vmem:[%s4023_s4 + $0xb8] sm:$0xff]  ;;  %v2133_v2 = vld [vmem:[%s4023_s4 + $0xb0] sm:$0xff] }
 0x138   :  { %v2610_v9 = vpop.f32.mrf.mxu0  ;;  %v2653_v10 = vpop.f32.mrf.mxu1  ;;  %v944_v61 = vld [vmem:[#allocation3] sm:$0xff]  ;;  %v2147_v38 = vld [vmem:[%s4025_s5 + $0xb8] sm:$0xff]  ;;  %v2146_v4 = vld [vmem:[%s4025_s5 + $0xb0] sm:$0xff] }
 0x139   :  { %932 = vst.msk [vmem:[#allocation3 + $0x8] sm:$0xff] %vm75_vm0, %v927_v5  ;;  %v878_v42 = vmax.f32 %v741_v6, %v869_v7  ;;  %945 = vst.msk [vmem:[#allocation4 + $0x1] sm:$0xff] %vm75_vm0, %v944_v61  ;;  %v2132_v5 = vld [vmem:[%s4023_s4 + $0xa8] sm:$0xff]  ;;  %v2131_v7 = vld [vmem:[%s4023_s4 + $0xa0] sm:$0xff] }
 0x13a   :  { %v894_v43 = vld [vmem:[#allocation2 + $0x20] ss:$2 sm:$0xff]  ;;  %v904_v31 = vld [vmem:[#allocation2 + $0x21] ss:$2 sm:$0xff]  ;;  %v730_v12 = vpop.f32.mrf.mxu0  ;;  %v858_v13 = vpop.f32.mrf.mxu1  ;;  %v2130_v10 = vld [vmem:[%s4023_s4 + $0x98] sm:$0xff] }
 0x13b   :  { %v911_v14 = vmax.f32 %v894_v43, %v904_v31  ;;  %887 = vst.msk [vmem:[#allocation2 + $0x38] sm:$0xff] %vm75_vm0, %v878_v42  ;;  %v742_v3 = vadd.f32 %v730_v12, %v3577_v8  ;;  %v870_v15 = vadd.f32 %v858_v13, %v576_v11  ;;  %v972_v8 = vld [vmem:[%s4025_s5 + $0x38] sm:$0xff]  ;;  %v2145_v6 = vld [vmem:[%s4025_s5 + $0xa8] sm:$0xff]  ;;  %v2144_v9 = vld [vmem:[%s4025_s5 + $0xa0] sm:$0xff] }
 0x13c   :  { %v2613_v16 = vpop.f32.mrf.mxu0  ;;  %v2656_v17 = vpop.f32.mrf.mxu1  ;;  %v2143_v61 = vld [vmem:[%s4025_s5 + $0x98] sm:$0xff]  ;;  %v2129_v11 = vld [vmem:[%s4023_s4 + $0x90] sm:$0xff]  ;;  %v2128_v43 = vld [vmem:[%s4023_s4 + $0x88] sm:$0xff] }
 0x13d   :  { %v923_v47 = vadd.f32 %v3605_v41, %v911_v14  ;;  %v879_v48 = vmax.f32 %v742_v3, %v870_v15  ;;  %v2142_v42 = vld [vmem:[%s4025_s5 + $0x90] sm:$0xff]  ;;  %v2141_v31 = vld [vmem:[%s4025_s5 + $0x88] sm:$0xff]  ;;  %v2127_v12 = vld [vmem:[%s4023_s4 + $0x80] sm:$0xff] }
 0x13e   :  { %v2140_v13 = vld [vmem:[%s4025_s5 + $0x80] sm:$0xff] }
 0x13f   :  { %v928_v18 = vmax.f32 %v923_v47, 0.0  ;;  %889 = vst.msk [vmem:[#allocation2 + $0x40] sm:$0x7f] %vm888_vm3, %v879_v48  ;;  %v1662_v47 = vld [vmem:[%s4026_s7 + $0x38] sm:$0xff]  ;;  %v1661_v48 = vld [vmem:[%s4026_s7 + $0x30] sm:$0xff] }
 0x140   :  { %v3635_v21 = vld [vmem:[#allocation4 + $0x1] sm:$0xff] }
 0x141   :  { %v3637_v19 = vld [vmem:[#allocation4] sm:$0xff]  ;;  %933 = vst.msk [vmem:[#allocation3 + $0x10] sm:$0xff] %vm75_vm0, %v928_v18  ;;  %2674 = vmatmul.mubr.msk.f32.vlgmr.msra.gmra.mxu0 %vm75_vm0, %v3635_v21  ;;  %v2161_v18 = vld [vmem:[%s4026_s7 + $0x78] sm:$0xff] }
 0x142   :  { %2705 = vmatmul.mubr.msk.f32.vlgmr.msra.gmra.mxu1 %vm75_vm0, %v3637_v19  ;;  %v896_v22 = vld [vmem:[#allocation2 + $0x30] ss:$2 sm:$0xff]  ;;  %v906_v25 = vld [vmem:[#allocation2 + $0x31] ss:$2 sm:$0xff]  ;;  %2676 = vmatprep.mubr.msk.f32.mxu0 %vm2922_vm1, %v2921_v0 }
 0x143   :  { %2707 = vmatprep.mubr.msk.f32.mxu1 %vm2922_vm1, %v2921_v0  ;;  %v912_v29 = vmax.f32 %v896_v22, %v906_v25  ;;  %2720 = vmatpush3.msra.mxu0 %v2116_v36  ;;  %v1386_v14 = vld [vmem:[#allocation4 + $0x2] sm:$0xff]  ;;  %v1660_v36 = vld [vmem:[%s4026_s7 + $0x28] sm:$0xff]  ;;  %v2158_v22 = vld [vmem:[%s4026_s7 + $0x60] sm:$0xff] }
 0x144   :  { %2751 = vmatpush3.msra.mxu1 %v972_v8  ;;  %2721 = vmatprep.subr.mxu0 %v2921_v0  ;;  %v2159_v8 = vld [vmem:[%s4026_s7 + $0x68] sm:$0xff]  ;;  %v1657_v25 = vld [vmem:[%s4026_s7 + $0x10] sm:$0xff] }
 0x145   :  { %2752 = vmatprep.subr.mxu1 %v2921_v0  ;;  %v924_v30 = vadd.f32 %v3605_v41, %v912_v29  ;;  %2722 = vmatpush3.msra.mxu0 %v2115_v20  ;;  %v1658_v20 = vld [vmem:[%s4026_s7 + $0x18] sm:$0xff]  ;;  %v1656_v29 = vld [vmem:[%s4026_s7 + $0x8] sm:$0xff] }
 0x146   :  { %2753 = vmatpush3.msra.mxu1 %v971_v26  ;;  %v898_v35 = vld [vmem:[#allocation2 + $0x40] ss:$2 sm:$0x7]  ;;  %v908_v39 = vld [vmem:[#allocation2 + $0x41] ss:$2 sm:$0x7]  ;;  %2723 = vmatprep.subr.mxu0 %v2921_v0 }
 0x147   :  { %2754 = vmatprep.subr.mxu1 %v2921_v0  ;;  %v929_v27 = vmax.f32 %v924_v30, 0.0  ;;  %v913_v28 = vmax.f32 %v898_v35, %v908_v39  ;;  %2724 = vmatpush3.msra.mxu0 %v2114_v23  ;;  %v2157_v26 = vld [vmem:[%s4026_s7 + $0x58] sm:$0xff]  ;;  %v2156_v23 = vld [vmem:[%s4026_s7 + $0x50] sm:$0xff]  ;;  %v2155_v30 = vld [vmem:[%s4026_s7 + $0x48] sm:$0xff] }
 0x148   :  { %2755 = vmatpush3.msra.mxu1 %v970_v24  ;;  %v946_v40 = vld [vmem:[#allocation3 + $0x9] sm:$0xff]  ;;  %2725 = vmatprep.subr.mxu0 %v2921_v0  ;;  %v1655_v24 = vld [vmem:[%s4026_s7] sm:$0xff] }
 0x149   :  { %2756 = vmatprep.subr.mxu1 %v2921_v0  ;;  %934 = vst.msk [vmem:[#allocation3 + $0x18] sm:$0xff] %vm75_vm0, %v929_v27  ;;  %v925_v49 = vadd.f32 %v3605_v41, %v913_v28  ;;  %947 = vst.msk [vmem:[#allocation4 + $0xb] sm:$0xff] %vm75_vm0, %v946_v40  ;;  %2726 = vmatpush3.msra.mxu0 %v2113_v34  ;;  %v2110_v41 = vld [vmem:[%s4025_s5 + $0x48] sm:$0xff]  ;;  %v2154_v34 = vld [vmem:[%s4026_s7 + $0x40] sm:$0xff] }
 0x14a   :  { %2757 = vmatpush3.msra.mxu1 %v969_v46  ;;  %2727 = vmatprep.subr.mxu0 %v2921_v0 }
 0x14b   :  { %2758 = vmatprep.subr.mxu1 %v2921_v0  ;;  %v930_v53 = vmax.f32 %v925_v49, 0.0  ;;  %2728 = vmatpush3.msra.mxu0 %v2112_v44 }
 0x14c   :  { %2759 = vmatpush3.msra.mxu1 %v968_v45  ;;  %2729 = vmatprep.subr.mxu0 %v2921_v0 }
 0x14d   :  { %2760 = vmatprep.subr.mxu1 %v2921_v0  ;;  %936 = vst.msk [vmem:[#allocation3 + $0x20] sm:$0x7] %vm935_vm4, %v930_v53  ;;  %2730 = vmatpush3.msra.mxu0 %v2111_v50 }
 0x14e   :  { %2761 = vmatpush3.msra.mxu1 %v967_v52  ;;  %2731 = vmatprep.subr.mxu0 %v2921_v0 }
 0x14f   :  { %2762 = vmatprep.subr.mxu1 %v2921_v0  ;;  %2732 = vmatpush3.msra.mxu0 %v2110_v41 }
 0x150   :  { %2763 = vmatpush3.msra.mxu1 %v966_v54  ;;  %v974_v32 = vld [vmem:[#allocation4 + $0x9] sm:$0xff]  ;;  %2733 = vmatprep.subr.mxu0 %v2921_v0 }
 0x151   :  { %v953_v33 = vld [vmem:[#allocation4 + $0x8] sm:$0xff]  ;;  %2764 = vmatprep.subr.mxu1 %v2921_v0  ;;  %2677 = vmatmul.mubr.msk.f32.gmra.mxu0 %vm75_vm0, %v974_v32 }
 0x152   :  { %v948_v57 = vld [vmem:[#allocation3 + $0x12] sm:$0xff]  ;;  %2708 = vmatmul.mubr.msk.f32.gmra.mxu1 %vm75_vm0, %v953_v33  ;;  %2679 = vmatprep.mubr.msk.f32.mxu0 %vm2922_vm1, %v2921_v0 }
 0x153   :  { %949 = vst.msk [vmem:[#allocation4 + $0x15] sm:$0xff] %vm75_vm0, %v948_v57  ;;  %2710 = vmatprep.mubr.msk.f32.mxu1 %vm2922_vm1, %v2921_v0  ;;  %2734 = vmatpush3.msra.mxu0 %v2109_v51  ;;  %v1387_v3 = vld [vmem:[#allocation4 + $0xa] sm:$0xff] }
 0x154   :  { %2765 = vmatpush3.msra.mxu1 %v965_v55  ;;  %v950_v58 = vld [vmem:[#allocation3 + $0x1b] sm:$0xff]  ;;  %2781 = vmatprep.subr.mxu0 %v2921_v0 }
 0x155   :  { %2812 = vmatprep.subr.mxu1 %v2921_v0  ;;  %951 = vst.msk [vmem:[#allocation4 + $0x1f] sm:$0xff] %vm75_vm0, %v950_v58 }
 0x15a   :  { %v975_v59 = vld [vmem:[#allocation4 + $0x11] sm:$0xff] }
 0x15b   :  { %v954_v60 = vld [vmem:[#allocation4 + $0x10] sm:$0xff]  ;;  %2680 = vmatmul.mubr.msk.f32.gmra.mxu0 %vm75_vm0, %v975_v59 }
 0x15c   :  { %2711 = vmatmul.mubr.msk.f32.gmra.mxu1 %vm75_vm0, %v954_v60  ;;  %2682 = vmatprep.mubr.msk.f32.mxu0 %vm2922_vm1, %v2921_v0  ;;  %v976_v62 = vld [vmem:[#allocation4 + $0x19] sm:$0xff]  ;;  %v977_v63 = vld [vmem:[#allocation4 + $0x21] sm:$0x7f] }
 0x15d   :  { %2713 = vmatprep.mubr.msk.f32.mxu1 %vm2922_vm1, %v2921_v0  ;;  %v955_v56 = vld [vmem:[#allocation4 + $0x18] sm:$0xff]  ;;  %v956_v1 = vld [vmem:[#allocation4 + $0x20] sm:$0x7f] }
 0x15e   :  { %v1388_v15 = vld [vmem:[#allocation4 + $0x12] sm:$0xff]  ;;  %v1389_v16 = vld [vmem:[#allocation4 + $0x1a] sm:$0xff]  ;;  %v1390_v17 = vld [vmem:[#allocation4 + $0x22] sm:$0x7f] }
 0x15f   :  { %2683 = vmatmul.mubr.msk.f32.gmra.mxu0 %vm75_vm0, %v976_v62 }
 0x160   :  { %2714 = vmatmul.mubr.msk.f32.gmra.mxu1 %vm75_vm0, %v955_v56  ;;  %2685 = vmatprep.mubr.msk.f32.mxu0 %vm2922_vm1, %v2921_v0 }
 0x161   :  { %2716 = vmatprep.mubr.msk.f32.mxu1 %vm2922_vm1, %v2921_v0 }
 0x163   :  { %2686 = vmatmul.mubr.msk.f32.gmra.mxu0 %vm75_vm0, %v977_v63 }
 0x164   :  { %2717 = vmatmul.mubr.msk.f32.gmra.mxu1 %vm75_vm0, %v956_v1  ;;  %2735 = vmatprep.mubr.msk.f32.mxu0 %vm2922_vm1, %v2921_v0 }
 0x165   :  { %2766 = vmatprep.mubr.msk.f32.mxu1 %vm2922_vm1, %v2921_v0 }
 0x167   :  { %2736 = vmatmul.mubr.msk.f32.vlgmr.msra.gmra.mxu0 %vm75_vm0, %v3635_v21  ;;  %v2160_v21 = vld [vmem:[%s4026_s7 + $0x70] sm:$0xff] }
 0x168   :  { %2767 = vmatmul.mubr.msk.f32.vlgmr.msra.gmra.mxu1 %vm75_vm0, %v3637_v19  ;;  %2782 = vmatpush3.msra.mxu0 %v2134_v37  ;;  %v1659_v19 = vld [vmem:[%s4026_s7 + $0x20] sm:$0xff] }
 0x169   :  { %2813 = vmatpush3.msra.mxu1 %v2147_v38  ;;  %2738 = vmatprep.mubr.msk.f32.mxu0 %vm2922_vm1, %v2921_v0 }
 0x16a   :  { %2769 = vmatprep.mubr.msk.f32.mxu1 %vm2922_vm1, %v2921_v0  ;;  %2783 = vmatprep.subr.mxu0 %v2921_v0 }
 0x16b   :  { %2814 = vmatprep.subr.mxu1 %v2921_v0  ;;  %2739 = vmatmul.mubr.msk.f32.gmra.mxu0 %vm75_vm0, %v974_v32 }
 0x16c   :  { %2770 = vmatmul.mubr.msk.f32.gmra.mxu1 %vm75_vm0, %v953_v33  ;;  %2784 = vmatpush3.msra.mxu0 %v2133_v2 }
 0x16d   :  { %2815 = vmatpush3.msra.mxu1 %v2146_v4  ;;  %2785 = vmatprep.subr.mxu0 %v2921_v0 }
 0x16e   :  { %2816 = vmatprep.subr.mxu1 %v2921_v0  ;;  %2786 = vmatpush3.msra.mxu0 %v2132_v5 }
 0x16f   :  { %2817 = vmatpush3.msra.mxu1 %v2145_v6  ;;  %2741 = vmatprep.mubr.msk.f32.mxu0 %vm2922_vm1, %v2921_v0 }
 0x170   :  { %2772 = vmatprep.mubr.msk.f32.mxu1 %vm2922_vm1, %v2921_v0  ;;  %2742 = vmatmul.mubr.msk.f32.gmra.mxu0 %vm75_vm0, %v975_v59 }
 0x171   :  { %2773 = vmatmul.mubr.msk.f32.gmra.mxu1 %vm75_vm0, %v954_v60  ;;  %2787 = vmatprep.subr.mxu0 %v2921_v0 }
 0x172   :  { %2818 = vmatprep.subr.mxu1 %v2921_v0  ;;  %2788 = vmatpush3.msra.mxu0 %v2131_v7 }
 0x173   :  { %2819 = vmatpush3.msra.mxu1 %v2144_v9  ;;  %2789 = vmatprep.subr.mxu0 %v2921_v0 }
 0x174   :  { %2820 = vmatprep.subr.mxu1 %v2921_v0  ;;  %2744 = vmatprep.mubr.msk.f32.mxu0 %vm2922_vm1, %v2921_v0 }
 0x175   :  { %2775 = vmatprep.mubr.msk.f32.mxu1 %vm2922_vm1, %v2921_v0  ;;  %2790 = vmatpush3.msra.mxu0 %v2130_v10 }
 0x176   :  { %2821 = vmatpush3.msra.mxu1 %v2143_v61  ;;  %2745 = vmatmul.mubr.msk.f32.gmra.mxu0 %vm75_vm0, %v976_v62 }
 0x177   :  { %2776 = vmatmul.mubr.msk.f32.gmra.mxu1 %vm75_vm0, %v955_v56  ;;  %2791 = vmatprep.subr.mxu0 %v2921_v0 }
 0x178   :  { %2822 = vmatprep.subr.mxu1 %v2921_v0  ;;  %2792 = vmatpush3.msra.mxu0 %v2129_v11 }
 0x179   :  { %2823 = vmatpush3.msra.mxu1 %v2142_v42  ;;  %2747 = vmatprep.mubr.msk.f32.mxu0 %vm2922_vm1, %v2921_v0 }
 0x17a   :  { %2778 = vmatprep.mubr.msk.f32.mxu1 %vm2922_vm1, %v2921_v0  ;;  %2793 = vmatprep.subr.mxu0 %v2921_v0 }
 0x17b   :  { %2824 = vmatprep.subr.mxu1 %v2921_v0  ;;  %2748 = vmatmul.mubr.msk.f32.gmra.mxu0 %vm75_vm0, %v977_v63 }
 0x17c   :  { %2779 = vmatmul.mubr.msk.f32.gmra.mxu1 %vm75_vm0, %v956_v1  ;;  %2794 = vmatpush3.msra.mxu0 %v2128_v43 }
 0x17d   :  { %2825 = vmatpush3.msra.mxu1 %v2141_v31  ;;  %2795 = vmatprep.subr.mxu0 %v2921_v0 }
 0x17e   :  { %2826 = vmatprep.subr.mxu1 %v2921_v0  ;;  %2796 = vmatpush3.msra.mxu0 %v2127_v12 }
 0x17f   :  { %2797 = vmatprep.mubr.msk.f32.mxu0 %vm2922_vm1, %v2921_v0  ;;  %2827 = vmatpush3.msra.mxu1 %v2140_v13 }
 0x180   :  { %2828 = vmatprep.mubr.msk.f32.mxu1 %vm2922_vm1, %v2921_v0  ;;  %2798 = vmatmul.mubr.msk.f32.vlgmr.msra.gmra.mxu0 %vm75_vm0, %v1386_v14 }
 0x181   :  { %2829 = vmatmul.mubr.msk.f32.vlgmr.msra.gmra.mxu1 %vm75_vm0, %v1386_v14  ;;  %2800 = vmatprep.mubr.msk.f32.mxu0 %vm2922_vm1, %v2921_v0 }
 0x182   :  { %2831 = vmatprep.mubr.msk.f32.mxu1 %vm2922_vm1, %v2921_v0  ;;  %2862 = vmatprep.subr.mxu1 %v2921_v0 }
 0x183   :  { %2843 = vmatprep.subr.mxu0 %v2921_v0  ;;  %2863 = vmatpush3.msra.mxu1 %v1662_v47 }
 0x184   :  { %2801 = vmatmul.mubr.msk.f32.gmra.mxu0 %vm75_vm0, %v1387_v3  ;;  %2864 = vmatprep.subr.mxu1 %v2921_v0 }
 0x185   :  { %2832 = vmatmul.mubr.msk.f32.gmra.mxu1 %vm75_vm0, %v1387_v3  ;;  %2803 = vmatprep.mubr.msk.f32.mxu0 %vm2922_vm1, %v2921_v0 }
 0x186   :  { %2834 = vmatprep.mubr.msk.f32.mxu1 %vm2922_vm1, %v2921_v0  ;;  %2865 = vmatpush3.msra.mxu1 %v1661_v48 }
 0x187   :  { %2866 = vmatprep.subr.mxu1 %v2921_v0  ;;  %2844 = vmatpush3.msra.mxu0 %v2161_v18 }
 0x188   :  { %2804 = vmatmul.mubr.msk.f32.gmra.mxu0 %vm75_vm0, %v1388_v15  ;;  %2867 = vmatpush3.msra.mxu1 %v1660_v36 }
 0x189   :  { %2835 = vmatmul.mubr.msk.f32.gmra.mxu1 %vm75_vm0, %v1388_v15  ;;  %2806 = vmatprep.mubr.msk.f32.mxu0 %vm2922_vm1, %v2921_v0 }
 0x18a   :  { %2837 = vmatprep.mubr.msk.f32.mxu1 %vm2922_vm1, %v2921_v0  ;;  %2845 = vmatprep.subr.mxu0 %v2921_v0 }
 0x18b   :  { %2868 = vmatprep.subr.mxu1 %v2921_v0  ;;  %2846 = vmatpush3.msra.mxu0 %v2160_v21 }
 0x18c   :  { %2807 = vmatmul.mubr.msk.f32.gmra.mxu0 %vm75_vm0, %v1389_v16  ;;  %2869 = vmatpush3.msra.mxu1 %v1659_v19 }
 0x18d   :  { %2838 = vmatmul.mubr.msk.f32.gmra.mxu1 %vm75_vm0, %v1389_v16  ;;  %2809 = vmatprep.mubr.msk.f32.mxu0 %vm2922_vm1, %v2921_v0 }
 0x18e   :  { %2840 = vmatprep.mubr.msk.f32.mxu1 %vm2922_vm1, %v2921_v0  ;;  %2847 = vmatprep.subr.mxu0 %v2921_v0 }
 0x18f   :  { %2870 = vmatprep.subr.mxu1 %v2921_v0  ;;  %2848 = vmatpush3.msra.mxu0 %v2159_v8 }
 0x190   :  { %2810 = vmatmul.mubr.msk.f32.gmra.mxu0 %vm75_vm0, %v1390_v17  ;;  %2871 = vmatpush3.msra.mxu1 %v1658_v20 }
 0x191   :  { %2841 = vmatmul.mubr.msk.f32.gmra.mxu1 %vm75_vm0, %v1390_v17  ;;  %2859 = vmatprep.mubr.msk.f32.mxu0 %vm2922_vm1, %v2921_v0 }
 0x192   :  { %2878 = vmatprep.mubr.msk.f32.mxu1 %vm2922_vm1, %v2921_v0  ;;  %2849 = vmatprep.subr.mxu0 %v2921_v0 }
 0x193   :  { %2872 = vmatprep.subr.mxu1 %v2921_v0  ;;  %2850 = vmatpush3.msra.mxu0 %v2158_v22 }
 0x194   :  { %2873 = vmatpush3.msra.mxu1 %v1657_v25  ;;  %2851 = vmatprep.subr.mxu0 %v2921_v0 }
 0x195   :  { %2874 = vmatprep.subr.mxu1 %v2921_v0  ;;  %2852 = vmatpush3.msra.mxu0 %v2157_v26 }
 0x196   :  { %2875 = vmatpush3.msra.mxu1 %v1656_v29  ;;  %2853 = vmatprep.subr.mxu0 %v2921_v0 }
 0x197   :  { %2876 = vmatprep.subr.mxu1 %v2921_v0  ;;  %2854 = vmatpush3.msra.mxu0 %v2156_v23 }
 0x198   :  { %2877 = vmatpush3.msra.mxu1 %v1655_v24  ;;  %2855 = vmatprep.subr.mxu0 %v2921_v0 }
 0x199   :  { %2900 = vmatprep.subr.mxu1 %v2921_v0  ;;  %2856 = vmatpush3.msra.mxu0 %v2155_v30 }
 0x19a   :  { %2857 = vmatprep.subr.mxu0 %v2921_v0 }
 0x19b   :  { %2858 = vmatpush3.msra.mxu0 %v2154_v34 }
 0x19c   :  { %2881 = vmatprep.subr.mxu0 %v2921_v0 }
 0x201   :  { %v1068_v46 = vpop.f32.mrf.mxu0 }
 0x202   :  { %v1173_v35 = vpop.f32.mrf.mxu1 }
 0x203   :  { %v2675_v39 = vpop.f32.mrf.mxu0  ;;  %v1174_v12 = vadd.f32 %v1173_v35, %v1068_v46 }
 0x204   :  { %v2706_v27 = vpop.f32.mrf.mxu1 }
 0x211   :  { %v1073_v28 = vpop.f32.mrf.mxu0 }
 0x212   :  { %v1178_v40 = vpop.f32.mrf.mxu1 }
 0x213   :  { %v2678_v44 = vpop.f32.mrf.mxu0  ;;  %v1179_v48 = vadd.f32 %v1178_v40, %v1073_v28 }
 0x214   :  { %v2709_v45 = vpop.f32.mrf.mxu1 }
 0x21b   :  { %v1078_v49 = vpop.f32.mrf.mxu0 }
 0x21c   :  { %v1183_v50 = vpop.f32.mrf.mxu1 }
 0x21d   :  { %v2681_v52 = vpop.f32.mrf.mxu0  ;;  %v1184_v26 = vadd.f32 %v1183_v50, %v1078_v49 }
 0x21e   :  { %v2712_v53 = vpop.f32.mrf.mxu1 }
 0x21f   :  { %v1083_v41 = vpop.f32.mrf.mxu0 }
 0x220   :  { %v1188_v54 = vpop.f32.mrf.mxu1 }
 0x221   :  { %v2684_v51 = vpop.f32.mrf.mxu0  ;;  %v1189_v27 = vadd.f32 %v1188_v54, %v1083_v41  ;;  %v2153_v41 = vld [vmem:[%s4027_s6] ss:$0 sm:$0xff] }
 0x222   :  { %v2715_v55 = vpop.f32.mrf.mxu1 }
 0x223   :  { %v3930_v32 = vpop.f32.mrf.mxu0 }
 0x224   :  { %v1193_v33 = vpop.f32.mrf.mxu1 }
 0x225   :  { %v2687_v57 = vpop.f32.mrf.mxu0  ;;  %v1194_v51 = vadd.f32 %v1193_v33, %v3930_v32 }
 0x226   :  { %v2718_v58 = vpop.f32.mrf.mxu1 }
 0x227   :  { %v1272_v59 = vpop.f32.mrf.mxu0 }
 0x228   :  { %v1362_v60 = vpop.f32.mrf.mxu1 }
 0x229   :  { %v2737_v62 = vpop.f32.mrf.mxu0  ;;  %v1363_v13 = vadd.f32 %v1362_v60, %v1272_v59 }
 0x22a   :  { %v2768_v56 = vpop.f32.mrf.mxu1 }
 0x22b   :  { %v1277_v63 = vpop.f32.mrf.mxu0 }
 0x22c   :  { %v1367_v1 = vpop.f32.mrf.mxu1 }
 0x22d   :  { %v2740_v37 = vpop.f32.mrf.mxu0  ;;  %v1368_v18 = vadd.f32 %v1367_v1, %v1277_v63 }
 0x22e   :  { %v2771_v38 = vpop.f32.mrf.mxu1 }
 0x230   :  { %v1282_v2 = vpop.f32.mrf.mxu0 }
 0x231   :  { %v1372_v4 = vpop.f32.mrf.mxu1 }
 0x232   :  { %v2743_v5 = vpop.f32.mrf.mxu0  ;;  %v1373_v29 = vadd.f32 %v1372_v4, %v1282_v2 }
 0x233   :  { %v2774_v6 = vpop.f32.mrf.mxu1 }
 0x236   :  { %v1287_v7 = vpop.f32.mrf.mxu0 }
 0x237   :  { %v1377_v9 = vpop.f32.mrf.mxu1 }
 0x238   :  { %v2746_v10 = vpop.f32.mrf.mxu0  ;;  %v1378_v28 = vadd.f32 %v1377_v9, %v1287_v7 }
 0x239   :  { %v2777_v61 = vpop.f32.mrf.mxu1 }
 0x23b   :  { %v1292_v11 = vpop.f32.mrf.mxu0 }
 0x23c   :  { %v1382_v42 = vpop.f32.mrf.mxu1 }
 0x23d   :  { %v2749_v43 = vpop.f32.mrf.mxu0  ;;  %v1383_v55 = vadd.f32 %v1382_v42, %v1292_v11 }
 0x23e   :  { %v2780_v31 = vpop.f32.mrf.mxu1  ;;  %v2180_v43 = vld [vmem:[%s4026_s7 + $0xf8] sm:$0xff] }
 0x240   :  { %v1481_v14 = vpop.f32.mrf.mxu0 }
 0x241   :  { %v1585_v3 = vpop.f32.mrf.mxu1  ;;  %v1505_v15 = vadd.f32 %v1481_v14, %v1174_v12  ;;  %v2179_v12 = vld [vmem:[%s4026_s7 + $0xf0] sm:$0xff]  ;;  %v2178_v14 = vld [vmem:[%s4026_s7 + $0xe8] sm:$0xff] }
 0x242   :  { %v1609_v16 = vadd.f32 %v1585_v3, %v1363_v13  ;;  %v2799_v17 = vpop.f32.mrf.mxu0  ;;  %v2171_v13 = vld [vmem:[%s4026_s7 + $0xb8] sm:$0xff] }
 0x243   :  { %v2830_v47 = vpop.f32.mrf.mxu1  ;;  %v2169_v17 = vld [vmem:[%s4026_s7 + $0xa8] sm:$0xff] }
 0x244   :  { %v1614_v36 = vmax.f32 %v1505_v15, %v1609_v16  ;;  %v1486_v21 = vpop.f32.mrf.mxu0  ;;  %v2170_v15 = vld [vmem:[%s4026_s7 + $0xb0] sm:$0xff]  ;;  %v2177_v16 = vld [vmem:[%s4026_s7 + $0xe0] sm:$0xff]  ;;  %v2176_v47 = vld [vmem:[%s4026_s7 + $0xd8] sm:$0xff] }
 0x245   :  { %v1590_v19 = vpop.f32.mrf.mxu1  ;;  %v1506_v8 = vadd.f32 %v1486_v21, %v1179_v48  ;;  %v2168_v48 = vld [vmem:[%s4026_s7 + $0xa0] sm:$0xff]  ;;  %v2174_v21 = vld [vmem:[%s4026_s7 + $0xc8] sm:$0xff] }
 0x246   :  { %1619 = vst.msk [vmem:[#allocation5] sm:$0xff] %vm75_vm0, %v1614_v36  ;;  %v1610_v20 = vadd.f32 %v1590_v19, %v1368_v18  ;;  %v2802_v22 = vpop.f32.mrf.mxu0  ;;  %v2175_v18 = vld [vmem:[%s4026_s7 + $0xd0] sm:$0xff]  ;;  %v2167_v36 = vld [vmem:[%s4026_s7 + $0x98] sm:$0xff] }
 0x247   :  { %v2833_v25 = vpop.f32.mrf.mxu1  ;;  %v2166_v19 = vld [vmem:[%s4026_s7 + $0x90] sm:$0xff] }
 0x248   :  { %v1615_v23 = vmax.f32 %v1506_v8, %v1610_v20  ;;  %v1491_v24 = vpop.f32.mrf.mxu0  ;;  %v2173_v8 = vld [vmem:[%s4026_s7 + $0xc0] sm:$0xff]  ;;  %v2165_v20 = vld [vmem:[%s4026_s7 + $0x88] sm:$0xff] }
 0x249   :  { %v1595_v30 = vpop.f32.mrf.mxu1  ;;  %v1507_v34 = vadd.f32 %v1491_v24, %v1184_v26  ;;  %v2164_v25 = vld [vmem:[%s4026_s7 + $0x80] sm:$0xff] }
 0x24a   :  { %1620 = vst.msk [vmem:[#allocation5 + $0x8] sm:$0xff] %vm75_vm0, %v1615_v23  ;;  %v1611_v46 = vadd.f32 %v1595_v30, %v1373_v29  ;;  %v2805_v35 = vpop.f32.mrf.mxu0 }
 0x24b   :  { %v2836_v39 = vpop.f32.mrf.mxu1 }
 0x24c   :  { %v1616_v40 = vmax.f32 %v1507_v34, %v1611_v46  ;;  %v1496_v44 = vpop.f32.mrf.mxu0 }
 0x24d   :  { %v1600_v45 = vpop.f32.mrf.mxu1  ;;  %v1508_v52 = vadd.f32 %v1496_v44, %v1189_v27 }
 0x24e   :  { %1621 = vst.msk [vmem:[#allocation5 + $0x10] sm:$0xff] %vm75_vm0, %v1616_v40  ;;  %v1612_v53 = vadd.f32 %v1600_v45, %v1378_v28  ;;  %v2808_v49 = vpop.f32.mrf.mxu0  ;;  %v2182_v28 = vld [vmem:[%s4028_s8] ss:$0 sm:$0xff] }
 0x24f   :  { %v2839_v50 = vpop.f32.mrf.mxu1 }
 0x250   :  { %v1617_v57 = vmax.f32 %v1508_v52, %v1612_v53  ;;  %v1501_v54 = vpop.f32.mrf.mxu0 }
 0x251   :  { %v1624_v58 = vld [vmem:[#allocation5] ss:$2 sm:$0xff]  ;;  %v1630_v59 = vld [vmem:[#allocation5 + $0x1] ss:$2 sm:$0xff]  ;;  %v1605_v60 = vpop.f32.mrf.mxu1  ;;  %v1509_v56 = vadd.f32 %v1501_v54, %v1194_v51 }
 0x252   :  { %v1635_v62 = vmax.f32 %v1624_v58, %v1630_v59  ;;  %1622 = vst.msk [vmem:[#allocation5 + $0x18] sm:$0xff] %vm75_vm0, %v1617_v57  ;;  %v1613_v63 = vadd.f32 %v1605_v60, %v1383_v55  ;;  %v2811_v1 = vpop.f32.mrf.mxu0 }
 0x253   :  { %v2842_v37 = vpop.f32.mrf.mxu1 }
 0x254   :  { %v1645_v38 = vadd.f32 %v2153_v41, %v1635_v62  ;;  %v1618_v2 = vmax.f32 %v1509_v56, %v1613_v63 }
 0x256   :  { %v1648_v32 = vmax.f32 %v1645_v38, 0.0  ;;  %1623 = vst.msk [vmem:[#allocation5 + $0x20] sm:$0x7f] %vm888_vm3, %v1618_v2 }
 0x258   :  { %1651 = vst.msk [vmem:[#allocation6] sm:$0xff] %vm75_vm0, %v1648_v32 }
 0x259   :  { %v1626_v33 = vld [vmem:[#allocation5 + $0x10] ss:$2 sm:$0xff]  ;;  %v1632_v4 = vld [vmem:[#allocation5 + $0x11] ss:$2 sm:$0xff] }
 0x25a   :  { %v1636_v5 = vmax.f32 %v1626_v33, %v1632_v4 }
 0x25c   :  { %v1646_v6 = vadd.f32 %v2153_v41, %v1636_v5 }
 0x25d   :  { %v1628_v7 = vld [vmem:[#allocation5 + $0x20] ss:$2 sm:$0x7]  ;;  %v1634_v9 = vld [vmem:[#allocation5 + $0x21] ss:$2 sm:$0x7] }
 0x25e   :  { %v1649_v10 = vmax.f32 %v1646_v6, 0.0  ;;  %v1637_v61 = vmax.f32 %v1628_v7, %v1634_v9 }
 0x260   :  { %1652 = vst.msk [vmem:[#allocation6 + $0x8] sm:$0xff] %vm75_vm0, %v1649_v10  ;;  %v1647_v11 = vadd.f32 %v2153_v41, %v1637_v61 }
 0x262   :  { %v1650_v42 = vmax.f32 %v1647_v11, 0.0 }
 0x264   :  { %1653 = vst.msk [vmem:[#allocation6 + $0x10] sm:$0x7] %vm935_vm4, %v1650_v42 }
 0x267   :  { %v1654_v31 = vld [vmem:[#allocation6] ss:$5 sm:$0xf] }
 0x268   :  { %2879 = vmatmul.mubr.msk.f32.vlgmr.msra.gmra.mxu1 %vm75_vm0, %v1654_v31 }
 0x269   :  { %2901 = vmatpush3.msra.mxu1 %v2180_v43  ;;  %2916 = vmatprep.mubr.msk.f32.mxu1 %vm2922_vm1, %v2921_v0 }
 0x26a   :  { %2902 = vmatprep.subr.mxu1 %v2921_v0 }
 0x26b   :  { %2903 = vmatpush3.msra.mxu1 %v2179_v12  ;;  %v1664_v3 = vld [vmem:[#allocation6 + $0x1] ss:$5 sm:$0xf]  ;;  %v1906_v22 = vld [vmem:[#allocation6 + $0x3] ss:$5 sm:$0xf] }
 0x26c   :  { %2904 = vmatprep.subr.mxu1 %v2921_v0  ;;  %2860 = vmatmul.mubr.msk.f32.vlgmr.msra.gmra.mxu0 %vm75_vm0, %v1664_v3  ;;  %v1821_v26 = vld [vmem:[#allocation6 + $0x2] ss:$5 sm:$0xf] }
 0x26d   :  { %2882 = vmatpush3.msra.mxu0 %v2171_v13  ;;  %2905 = vmatpush3.msra.mxu1 %v2178_v14 }
 0x26e   :  { %2883 = vmatprep.subr.mxu0 %v2921_v0  ;;  %2906 = vmatprep.subr.mxu1 %v2921_v0 }
 0x26f   :  { %2884 = vmatpush3.msra.mxu0 %v2170_v15  ;;  %2907 = vmatpush3.msra.mxu1 %v2177_v16 }
 0x270   :  { %2885 = vmatprep.subr.mxu0 %v2921_v0  ;;  %2908 = vmatprep.subr.mxu1 %v2921_v0 }
 0x271   :  { %2886 = vmatpush3.msra.mxu0 %v2169_v17  ;;  %2909 = vmatpush3.msra.mxu1 %v2176_v47 }
 0x272   :  { %2887 = vmatprep.subr.mxu0 %v2921_v0  ;;  %2910 = vmatprep.subr.mxu1 %v2921_v0 }
 0x273   :  { %2888 = vmatpush3.msra.mxu0 %v2168_v48  ;;  %2911 = vmatpush3.msra.mxu1 %v2175_v18 }
 0x274   :  { %2889 = vmatprep.subr.mxu0 %v2921_v0  ;;  %2912 = vmatprep.subr.mxu1 %v2921_v0 }
 0x275   :  { %2890 = vmatpush3.msra.mxu0 %v2167_v36  ;;  %2913 = vmatpush3.msra.mxu1 %v2174_v21 }
 0x276   :  { %2891 = vmatprep.subr.mxu0 %v2921_v0  ;;  %2914 = vmatprep.subr.mxu1 %v2921_v0 }
 0x277   :  { %2892 = vmatpush3.msra.mxu0 %v2166_v19  ;;  %2915 = vmatpush3.msra.mxu1 %v2173_v8 }
 0x278   :  { %2893 = vmatprep.subr.mxu0 %v2921_v0  ;;  %2917 = vmatmul.mubr.msk.f32.vlgmr.msra.gmra.mxu1 %vm75_vm0, %v1906_v22 }
 0x279   :  { %2894 = vmatpush3.msra.mxu0 %v2165_v20  ;;  %2897 = vmatprep.mubr.msk.f32.mxu0 %vm2922_vm1, %v2921_v0 }
 0x27a   :  { %2895 = vmatprep.subr.mxu0 %v2921_v0 }
 0x27b   :  { %2896 = vmatpush3.msra.mxu0 %v2164_v25 }
 0x27c   :  { %2898 = vmatmul.mubr.msk.f32.vlgmr.msra.gmra.mxu0 %vm75_vm0, %v1821_v26 }
 0x328   :  { %v1816_v29 = vpop.f32.mrf.mxu1 }
 0x32a   :  { %v2880_v23 = vpop.f32.mrf.mxu1 }
 0x32c   :  { %v1743_v24 = vpop.f32.mrf.mxu0 }
 0x32d   :  { %v1817_v35 = vadd.f32 %v1816_v29, %v1743_v24 }
 0x32e   :  { %v2861_v30 = vpop.f32.mrf.mxu0 }
 0x338   :  { %v1985_v34 = vpop.f32.mrf.mxu1 }
 0x33a   :  { %v2918_v46 = vpop.f32.mrf.mxu1 }
 0x33c   :  { %v1900_v39 = vpop.f32.mrf.mxu0 }
 0x33d   :  { %v1904_v27 = vadd.f32 %v1900_v39, %v1817_v35 }
 0x33e   :  { %v2899_v40 = vpop.f32.mrf.mxu0 }
 0x33f   :  { %v1989_v44 = vadd.f32 %v1985_v34, %v1904_v27 }
 0x341   :  { %v1997_v0 = vadd.f32 %v2182_v28, %v1989_v44 }
 0x343   :  { %1999 = vst.msk [vmem:[%s4029_s9] sm:$0xf] %vm1998_vm5, %v1997_v0 }

</bundles_post_ra>
